<compile_context>
chip_gen: v7x
topology: tpu7x:2x2x1
jax: 0.10.0
libtpu: 0.0.40
codegen_flags: <defaults>
</compile_context>

<pallas_src>
import functools
import math

import jax
import jax.numpy as jnp
from jax.experimental import pallas as pl
from jax.experimental.pallas import tpu as pltpu

EPS = 1e-5  # FusedLayerNorm / nn.LayerNorm default eps


def _mish(x):
    # Mish(x) = x * tanh(softplus(x)); logaddexp(x, 0) is a stable softplus.
    return x * jnp.tanh(jnp.logaddexp(x, 0.0))


def _layer_norm(x, g, b):
    mu = jnp.mean(x, axis=-1, keepdims=True)
    var = jnp.mean((x - mu) ** 2, axis=-1, keepdims=True)
    return (x - mu) * jax.lax.rsqrt(var + EPS) * g + b


# ----------------------------- Pallas kernel ------------------------------ #
def mha_layer_kernel(*refs, num_heads, dim_qk, block_b, seq_len, mode):
    H, dk, L = num_heads, dim_qk, seq_len

    # Activation refs depend on mode: "self" (q=k=v), "cross" (k=v), "full".
    if mode == "self":
        x_ref, mask_ref = refs[:2]
        rest = refs[2:]
        xq = x_ref[...]
        xk = xv = xq
    elif mode == "cross":
        q_ref, kv_ref, mask_ref = refs[:3]
        rest = refs[3:]
        xq = q_ref[...]
        xk = xv = kv_ref[...]
    else:  # "full"
        q_ref, k_ref, v_ref, mask_ref = refs[:4]
        rest = refs[4:]
        xq = q_ref[...]
        xk = k_ref[...]
        xv = v_ref[...]

    (lnq_g, lnq_b, lnk_g, lnk_b, lnv_g, lnv_b,
     wq_ref, bq_ref, wk_ref, bk_ref, wv_ref, bv_ref,
     wp_ref, bp_ref, lno_g, lno_b,
     w1_ref, b1_ref, w2_ref, b2_ref, lnf_g, lnf_b,
     out_ref, attn_ref, cat_ref) = rest

    # Input LayerNorms on the whole (block_b*L, D) row slab.
    qn = _layer_norm(xq, lnq_g[...], lnq_b[...])
    kn = _layer_norm(xk, lnk_g[...], lnk_b[...])
    vn = _layer_norm(xv, lnv_g[...], lnv_b[...])

    # Batched-head projections: one (rows, D) @ (D, H*dk) matmul per Q/K/V.
    # 1/sqrt(dk) is pre-folded into wq/bq; per-head scale into wv/bv.
    q_all = jnp.dot(qn, wq_ref[...], preferred_element_type=jnp.float32) + bq_ref[...]
    k_all = jnp.dot(kn, wk_ref[...], preferred_element_type=jnp.float32) + bk_ref[...]
    v_all = jnp.dot(vn, wv_ref[...], preferred_element_type=jnp.float32) + bv_ref[...]

    # Mask compare hoisted out of the per-batch loop; >0 means "masked".
    mask_blk = mask_ref[...] > 0.0                         # (rows, L)

    # Attention: static loops over batch elements in the block and heads.
    for bi in range(block_b):
        r0 = bi * L
        qb = q_all[r0:r0 + L]
        kb = k_all[r0:r0 + L]
        vb = v_all[r0:r0 + L]
        masked = mask_blk[r0:r0 + L, :]                    # (L, L)
        for h in range(H):
            c0 = h * dk
            # Q_h @ K_h^T via dot_general contracting over dk (no transpose).
            logits = jax.lax.dot_general(
                qb[:, c0:c0 + dk], kb[:, c0:c0 + dk],
                (((1,), (1,)), ((), ())),
                preferred_element_type=jnp.float32)        # (L, L)
            logits = jnp.where(masked, -jnp.inf, logits)   # masked_fill
            m = jnp.max(logits, axis=-1, keepdims=True)
            e = jnp.exp(logits - m)
            attn = e * pl.reciprocal(jnp.sum(e, axis=-1, keepdims=True),
                                     approx=True)
            # All heads land in one lane-concatenated output slab.
            attn_ref[r0:r0 + L, h * L:(h + 1) * L] = attn
            # Head output into the concat accumulator (static slices, no concat).
            cat_ref[r0:r0 + L, c0:c0 + dk] = jnp.dot(
                attn, vb[:, c0:c0 + dk], preferred_element_type=jnp.float32)

    # MHAMixer output projection over concatenated heads.
    proj = jnp.dot(cat_ref[...], wp_ref[...],
                   preferred_element_type=jnp.float32) + bp_ref[...]

    # norm_out(dropout(out) + q_norm)
    out1 = _layer_norm(proj + qn, lno_g[...], lno_b[...])

    # FeedForward: Mish -> Linear -> Mish -> Linear -> Mish, residual LayerNorm.
    h1 = jnp.dot(_mish(out1), w1_ref[...], preferred_element_type=jnp.float32) + b1_ref[...]
    h2 = jnp.dot(_mish(h1), w2_ref[...], preferred_element_type=jnp.float32) + b2_ref[...]
    ffn = _layer_norm(out1 + _mish(h2), lnf_g[...], lnf_b[...])

    # MHALayer returns feed_forward(out) + out
    out_ref[...] = (ffn + out1).astype(out_ref.dtype)


# ------------------------------- wrappers ----------------------------------- #
_PACKED_ORDER = [
    "lnq_g", "lnq_b", "lnk_g", "lnk_b", "lnv_g", "lnv_b",
    "wq", "bq", "wk", "bk", "wv", "bv",
    "wp", "bp", "lno_g", "lno_b",
    "w1", "b1", "w2", "b2", "lnf_g", "lnf_b",
]


def pack_layer_params(p, *, num_heads, dim_qk):
    """Wrapper-side (free) re-layout of per-head params into MXU-friendly slabs."""
    H, dk = num_heads, dim_qk
    D = p["wq"].shape[1]
    inv_scale = 1.0 / math.sqrt(dk)
    hs = p["hscale"].reshape(H, 1, 1)
    packed = {
        # fold 1/sqrt(dk) into Q projection
        "wq": (p["wq"] * inv_scale).transpose(1, 0, 2).reshape(D, H * dk),
        "bq": (p["bq"] * inv_scale).reshape(1, H * dk),
        "wk": p["wk"].transpose(1, 0, 2).reshape(D, H * dk),
        "bk": p["bk"].reshape(1, H * dk),
        # fold per-head scale into V projection
        "wv": (p["wv"] * hs).transpose(1, 0, 2).reshape(D, H * dk),
        "bv": (p["bv"] * hs).reshape(1, H * dk),
    }
    for name in ("lnq_g", "lnq_b", "lnk_g", "lnk_b", "lnv_g", "lnv_b",
                 "wp", "bp", "lno_g", "lno_b",
                 "w1", "b1", "w2", "b2", "lnf_g", "lnf_b"):
        packed[name] = p[name]
    return packed


def mha_layer_2d(acts, mask2d, packed, *,
                 num_heads, dim_qk, seq_len, block_b, mode):
    """One MHALayer on (B*L, D) activation slabs. Returns (out2d, attn2d).

    `acts` is a tuple of activation slabs: 1 for mode="self" (q=k=v), 2 for
    mode="cross" (q, kv with k=v), 3 for mode="full" (q, k, v)."""
    rows, D = acts[0].shape
    B = rows // seq_len
    assert B % block_b == 0, "batch must be divisible by block_b"
    grid = (B // block_b,)
    rb = block_b * seq_len  # rows per grid step
    H = num_heads

    def row_spec(last):
        return pl.BlockSpec((rb, last), lambda i: (i, 0))

    def full_spec(shape):
        nd = len(shape)
        return pl.BlockSpec(tuple(shape), lambda i, nd=nd: (0,) * nd)

    in_specs = [row_spec(D) for _ in acts] + [row_spec(seq_len)]
    args = list(acts) + [mask2d]
    for name in _PACKED_ORDER:
        p = packed[name]
        args.append(p)
        in_specs.append(full_spec(p.shape))

    out_shape = (
        jax.ShapeDtypeStruct((rows, D), jnp.float32),
        jax.ShapeDtypeStruct((rows, H * seq_len), jnp.float32),
    )
    out_specs = (row_spec(D), row_spec(H * seq_len))

    kernel = functools.partial(
        mha_layer_kernel, num_heads=num_heads, dim_qk=dim_qk,
        block_b=block_b, seq_len=seq_len, mode=mode)

    return pl.pallas_call(
        kernel,
        out_shape=out_shape,
        grid=grid,
        in_specs=in_specs,
        out_specs=out_specs,
        scratch_shapes=[pltpu.VMEM((rb, H * dim_qk), jnp.float32)],
        compiler_params=pltpu.CompilerParams(
            dimension_semantics=("parallel",)),
    )(*args)


def fft_decoder(t, enc_seq, mask, packed_layers, *, num_heads, dim_qk,
                block_b=None):
    """FFTDecoder.forward (pe=None): alternating self / cross MHALayers."""
    B, L, D = t.shape
    if block_b is None:
        block_b = B  # collapse the whole batch into the matmul M dimension
    H = num_heads

    t2 = t.reshape(B * L, D)
    e2 = enc_seq.reshape(B * L, D)
    m2 = mask.reshape(B * L, L)

    attentions = []
    for p_one, p_two in packed_layers:
        # mha_one(t, t, t, mask): self-attention -> pass one activation slab.
        out2, _ = mha_layer_2d((t2,), m2, p_one,
                               num_heads=H, dim_qk=dim_qk,
                               seq_len=L, block_b=block_b, mode="self")
        # mha_two(out, enc, enc, mask): cross-attention with shared k=v slab.
        t2, a2 = mha_layer_2d((out2, e2), m2, p_two,
                              num_heads=H, dim_qk=dim_qk,
                              seq_len=L, block_b=block_b, mode="cross")
        # (B*L, H*L) -> (B, H, L, L), matching the per-head attention maps.
        attentions.append(a2.reshape(B, L, H, L).transpose(0, 2, 1, 3))
    return t2.reshape(B, L, D), attentions


# --------------------------- plain-JAX reference --------------------------- #
def mha_layer_ref(q, k, v, mask, p, *, num_heads, dim_qk):
    qn = _layer_norm(q, p["lnq_g"], p["lnq_b"])
    kn = _layer_norm(k, p["lnk_g"], p["lnk_b"])
    vn = _layer_norm(v, p["lnv_g"], p["lnv_b"])

    heads, attns = [], []
    for h in range(num_heads):
        Qh = qn @ p["wq"][h] + p["bq"][h]
        Kh = kn @ p["wk"][h] + p["bk"][h]
        Vh = vn @ p["wv"][h] + p["bv"][h]
        logits = jnp.einsum("bld,bmd->blm", Qh, Kh)
        logits = jnp.where(mask > 0.0, -jnp.inf, logits)
        attn = jax.nn.softmax(logits / math.sqrt(dim_qk), axis=-1)
        attns.append(attn)
        heads.append(p["hscale"][h] * jnp.einsum("blm,bmd->bld", attn, Vh))

    cat = jnp.concatenate(heads, axis=-1)
    proj = cat @ p["wp"] + p["bp"]
    out = _layer_norm(proj + qn, p["lno_g"], p["lno_b"])

    h1 = _mish(out) @ p["w1"] + p["b1"]
    h2 = _mish(h1) @ p["w2"] + p["b2"]
    ffn = _layer_norm(out + _mish(h2), p["lnf_g"], p["lnf_b"])
    return ffn + out, jnp.stack(attns, axis=1)


def fft_decoder_ref(t, enc_seq, mask, raw_layers, *, num_heads, dim_qk):
    attns = []
    for p1, p2 in raw_layers:
        out, _ = mha_layer_ref(t, t, t, mask, p1,
                               num_heads=num_heads, dim_qk=dim_qk)
        t, a = mha_layer_ref(out, enc_seq, enc_seq, mask, p2,
                             num_heads=num_heads, dim_qk=dim_qk)
        attns.append(a)
    return t, attns


# ------------------------------ param init --------------------------------- #
def init_params(key, dim_in, dim_qk, num_heads, dim_ff):
    D, dk, H, F_ = dim_in, dim_qk, num_heads, dim_ff
    ks = iter(jax.random.split(key, 32))

    def rnd(shape, fan_in):
        return jax.random.normal(next(ks), shape, jnp.float32) / math.sqrt(fan_in)

    def small(shape):
        return 0.1 * jax.random.normal(next(ks), shape, jnp.float32)

    p = {}
    for nm in ("lnq", "lnk", "lnv", "lno", "lnf"):
        p[f"{nm}_g"] = 1.0 + small((1, D))
        p[f"{nm}_b"] = small((1, D))
    # per-head KQVProduct linear layers, stacked over heads
    p["wq"] = rnd((H, D, dk), D); p["bq"] = small((H, 1, dk))
    p["wk"] = rnd((H, D, dk), D); p["bk"] = small((H, 1, dk))
    p["wv"] = rnd((H, D, dk), D); p["bv"] = small((H, 1, dk))
    p["hscale"] = 1.0 + small((H,))          # per-head nn.Parameter scale
    # MHAMixer output projection
    p["wp"] = rnd((H * dk, D), H * dk); p["bp"] = small((1, D))
    # FeedForward
    p["w1"] = rnd((D, F_), D); p["b1"] = small((1, F_))
    p["w2"] = rnd((F_, D), F_); p["b2"] = small((1, D))
    return p


# --------------------------------- main ------------------------------------ #
if __name__ == "__main__":
    B, L, D = 2, 8, 32          # batch, seq, dim_in
    dim_qk, num_heads, dim_ff = 8, 4, 64
    num_layers = 2

    key = jax.random.PRNGKey(0)
    kt, ke, kp = jax.random.split(key, 3)
    t = jax.random.normal(kt, (B, L, D), jnp.float32)
    enc_seq = jax.random.normal(ke, (B, L, D), jnp.float32)
    mask = jnp.zeros((B, L, L), jnp.float32)     # no positions masked

    pkeys = jax.random.split(kp, 2 * num_layers)
    raw_layers = []
    for li in range(num_layers):
        p_one = init_params(pkeys[2 * li], D, dim_qk, num_heads, dim_ff)
        p_two = init_params(pkeys[2 * li + 1], D, dim_qk, num_heads, dim_ff)
        raw_layers.append((p_one, p_two))

    packed_layers = [
        (pack_layer_params(p1, num_heads=num_heads, dim_qk=dim_qk),
         pack_layer_params(p2, num_heads=num_heads, dim_qk=dim_qk))
        for p1, p2 in raw_layers
    ]

    out, attns = fft_decoder(t, enc_seq, mask, packed_layers,
                             num_heads=num_heads, dim_qk=dim_qk)
    jax.block_until_ready((out, attns))

    out_ref, attns_ref = fft_decoder_ref(t, enc_seq, mask, raw_layers,
                                         num_heads=num_heads, dim_qk=dim_qk)

    assert out.shape == (B, L, D)
    assert len(attns) == num_layers
    assert attns[0].shape == (B, num_heads, L, L)
    assert bool(jnp.all(jnp.isfinite(out)))
    assert bool(jnp.allclose(out, out_ref, rtol=5e-2, atol=5e-2))
    for a, a_ref in zip(attns, attns_ref):
        assert bool(jnp.allclose(a, a_ref, rtol=5e-2, atol=5e-2))

    print("KERNEL_OK")
</pallas_src>

<mosaic_0001>
module attributes {stable_mosaic.version = 11 : i64} {
  func.func @mha_layer_kernel(%arg0: i32, %arg1: memref<16x32xf32, #tpu.memory_space<vmem>>, %arg2: memref<16x8xf32, #tpu.memory_space<vmem>>, %arg3: memref<1x32xf32, #tpu.memory_space<vmem>>, %arg4: memref<1x32xf32, #tpu.memory_space<vmem>>, %arg5: memref<1x32xf32, #tpu.memory_space<vmem>>, %arg6: memref<1x32xf32, #tpu.memory_space<vmem>>, %arg7: memref<1x32xf32, #tpu.memory_space<vmem>>, %arg8: memref<1x32xf32, #tpu.memory_space<vmem>>, %arg9: memref<32x32xf32, #tpu.memory_space<vmem>>, %arg10: memref<1x32xf32, #tpu.memory_space<vmem>>, %arg11: memref<32x32xf32, #tpu.memory_space<vmem>>, %arg12: memref<1x32xf32, #tpu.memory_space<vmem>>, %arg13: memref<32x32xf32, #tpu.memory_space<vmem>>, %arg14: memref<1x32xf32, #tpu.memory_space<vmem>>, %arg15: memref<32x32xf32, #tpu.memory_space<vmem>>, %arg16: memref<1x32xf32, #tpu.memory_space<vmem>>, %arg17: memref<1x32xf32, #tpu.memory_space<vmem>>, %arg18: memref<1x32xf32, #tpu.memory_space<vmem>>, %arg19: memref<32x64xf32, #tpu.memory_space<vmem>>, %arg20: memref<1x64xf32, #tpu.memory_space<vmem>>, %arg21: memref<64x32xf32, #tpu.memory_space<vmem>>, %arg22: memref<1x32xf32, #tpu.memory_space<vmem>>, %arg23: memref<1x32xf32, #tpu.memory_space<vmem>>, %arg24: memref<1x32xf32, #tpu.memory_space<vmem>>, %arg25: memref<16x32xf32, #tpu.memory_space<vmem>>, %arg26: memref<16x32xf32, #tpu.memory_space<vmem>>, %arg27: memref<16x32xf32, #tpu.memory_space<vmem>>) attributes {dimension_semantics = [#tpu.dimension_semantics<parallel>], iteration_bounds = array<i64: 1>, scalar_prefetch = 0 : i64, scratch_operands = 1 : i64, tpu.core_type = #tpu.core_type<tc>, window_params = [{transform_indices = @transform_0, window_bounds = array<i64: 16, 32>}, {transform_indices = @transform_1, window_bounds = array<i64: 16, 8>}, {pipeline_mode = #tpu.pipeline_mode<synchronous>, transform_indices = @transform_2, window_bounds = array<i64: 1, 32>}, {pipeline_mode = #tpu.pipeline_mode<synchronous>, transform_indices = @transform_3, window_bounds = array<i64: 1, 32>}, {pipeline_mode = #tpu.pipeline_mode<synchronous>, transform_indices = @transform_4, window_bounds = array<i64: 1, 32>}, {pipeline_mode = #tpu.pipeline_mode<synchronous>, transform_indices = @transform_5, window_bounds = array<i64: 1, 32>}, {pipeline_mode = #tpu.pipeline_mode<synchronous>, transform_indices = @transform_6, window_bounds = array<i64: 1, 32>}, {pipeline_mode = #tpu.pipeline_mode<synchronous>, transform_indices = @transform_7, window_bounds = array<i64: 1, 32>}, {pipeline_mode = #tpu.pipeline_mode<synchronous>, transform_indices = @transform_8, window_bounds = array<i64: 32, 32>}, {pipeline_mode = #tpu.pipeline_mode<synchronous>, transform_indices = @transform_9, window_bounds = array<i64: 1, 32>}, {pipeline_mode = #tpu.pipeline_mode<synchronous>, transform_indices = @transform_10, window_bounds = array<i64: 32, 32>}, {pipeline_mode = #tpu.pipeline_mode<synchronous>, transform_indices = @transform_11, window_bounds = array<i64: 1, 32>}, {pipeline_mode = #tpu.pipeline_mode<synchronous>, transform_indices = @transform_12, window_bounds = array<i64: 32, 32>}, {pipeline_mode = #tpu.pipeline_mode<synchronous>, transform_indices = @transform_13, window_bounds = array<i64: 1, 32>}, {pipeline_mode = #tpu.pipeline_mode<synchronous>, transform_indices = @transform_14, window_bounds = array<i64: 32, 32>}, {pipeline_mode = #tpu.pipeline_mode<synchronous>, transform_indices = @transform_15, window_bounds = array<i64: 1, 32>}, {pipeline_mode = #tpu.pipeline_mode<synchronous>, transform_indices = @transform_16, window_bounds = array<i64: 1, 32>}, {pipeline_mode = #tpu.pipeline_mode<synchronous>, transform_indices = @transform_17, window_bounds = array<i64: 1, 32>}, {pipeline_mode = #tpu.pipeline_mode<synchronous>, transform_indices = @transform_18, window_bounds = array<i64: 32, 64>}, {pipeline_mode = #tpu.pipeline_mode<synchronous>, transform_indices = @transform_19, window_bounds = array<i64: 1, 64>}, {pipeline_mode = #tpu.pipeline_mode<synchronous>, transform_indices = @transform_20, window_bounds = array<i64: 64, 32>}, {pipeline_mode = #tpu.pipeline_mode<synchronous>, transform_indices = @transform_21, window_bounds = array<i64: 1, 32>}, {pipeline_mode = #tpu.pipeline_mode<synchronous>, transform_indices = @transform_22, window_bounds = array<i64: 1, 32>}, {pipeline_mode = #tpu.pipeline_mode<synchronous>, transform_indices = @transform_23, window_bounds = array<i64: 1, 32>}, {transform_indices = @transform_24, window_bounds = array<i64: 16, 32>}, {transform_indices = @transform_25, window_bounds = array<i64: 16, 32>}]} {
    %c0 = arith.constant 0 : index
    %c0_0 = arith.constant 0 : index
    %0 = vector.load %arg1[%c0, %c0_0] : memref<16x32xf32, #tpu.memory_space<vmem>>, vector<16x32xf32>
    %c0_1 = arith.constant 0 : index
    %c0_2 = arith.constant 0 : index
    %1 = vector.load %arg3[%c0_1, %c0_2] : memref<1x32xf32, #tpu.memory_space<vmem>>, vector<1x32xf32>
    %c0_3 = arith.constant 0 : index
    %c0_4 = arith.constant 0 : index
    %2 = vector.load %arg4[%c0_3, %c0_4] : memref<1x32xf32, #tpu.memory_space<vmem>>, vector<1x32xf32>
    %cst = arith.constant dense<0.000000e+00> : vector<16xf32>
    %3 = vector.multi_reduction <add>, %0, %cst [1] : vector<16x32xf32> to vector<16xf32>
    %4 = vector.shape_cast %3 : vector<16xf32> to vector<16x1xf32>
    %cst_5 = arith.constant 3.200000e+01 : f32
    %5 = vector.broadcast %cst_5 : f32 to vector<16x1xf32>
    %6 = arith.divf %4, %5 : vector<16x1xf32>
    %7 = vector.broadcast %6 : vector<16x1xf32> to vector<16x32xf32>
    %8 = arith.subf %0, %7 : vector<16x32xf32>
    %9 = arith.mulf %8, %8 : vector<16x32xf32>
    %cst_6 = arith.constant dense<0.000000e+00> : vector<16xf32>
    %10 = vector.multi_reduction <add>, %9, %cst_6 [1] : vector<16x32xf32> to vector<16xf32>
    %11 = vector.shape_cast %10 : vector<16xf32> to vector<16x1xf32>
    %cst_7 = arith.constant 3.200000e+01 : f32
    %12 = vector.broadcast %cst_7 : f32 to vector<16x1xf32>
    %13 = arith.divf %11, %12 : vector<16x1xf32>
    %14 = vector.broadcast %6 : vector<16x1xf32> to vector<16x32xf32>
    %15 = arith.subf %0, %14 : vector<16x32xf32>
    %cst_8 = arith.constant 9.99999974E-6 : f32
    %16 = vector.broadcast %cst_8 : f32 to vector<16x1xf32>
    %17 = arith.addf %13, %16 : vector<16x1xf32>
    %18 = math.rsqrt %17 : vector<16x1xf32>
    %19 = vector.broadcast %18 : vector<16x1xf32> to vector<16x32xf32>
    %20 = arith.mulf %15, %19 : vector<16x32xf32>
    %21 = vector.broadcast %1 : vector<1x32xf32> to vector<16x32xf32>
    %22 = arith.mulf %20, %21 : vector<16x32xf32>
    %23 = vector.broadcast %2 : vector<1x32xf32> to vector<16x32xf32>
    %24 = arith.addf %22, %23 : vector<16x32xf32>
    %c0_9 = arith.constant 0 : index
    %c0_10 = arith.constant 0 : index
    %25 = vector.load %arg5[%c0_9, %c0_10] : memref<1x32xf32, #tpu.memory_space<vmem>>, vector<1x32xf32>
    %c0_11 = arith.constant 0 : index
    %c0_12 = arith.constant 0 : index
    %26 = vector.load %arg6[%c0_11, %c0_12] : memref<1x32xf32, #tpu.memory_space<vmem>>, vector<1x32xf32>
    %cst_13 = arith.constant dense<0.000000e+00> : vector<16xf32>
    %27 = vector.multi_reduction <add>, %0, %cst_13 [1] : vector<16x32xf32> to vector<16xf32>
    %28 = vector.shape_cast %27 : vector<16xf32> to vector<16x1xf32>
    %cst_14 = arith.constant 3.200000e+01 : f32
    %29 = vector.broadcast %cst_14 : f32 to vector<16x1xf32>
    %30 = arith.divf %28, %29 : vector<16x1xf32>
    %31 = vector.broadcast %30 : vector<16x1xf32> to vector<16x32xf32>
    %32 = arith.subf %0, %31 : vector<16x32xf32>
    %33 = arith.mulf %32, %32 : vector<16x32xf32>
    %cst_15 = arith.constant dense<0.000000e+00> : vector<16xf32>
    %34 = vector.multi_reduction <add>, %33, %cst_15 [1] : vector<16x32xf32> to vector<16xf32>
    %35 = vector.shape_cast %34 : vector<16xf32> to vector<16x1xf32>
    %cst_16 = arith.constant 3.200000e+01 : f32
    %36 = vector.broadcast %cst_16 : f32 to vector<16x1xf32>
    %37 = arith.divf %35, %36 : vector<16x1xf32>
    %38 = vector.broadcast %30 : vector<16x1xf32> to vector<16x32xf32>
    %39 = arith.subf %0, %38 : vector<16x32xf32>
    %cst_17 = arith.constant 9.99999974E-6 : f32
    %40 = vector.broadcast %cst_17 : f32 to vector<16x1xf32>
    %41 = arith.addf %37, %40 : vector<16x1xf32>
    %42 = math.rsqrt %41 : vector<16x1xf32>
    %43 = vector.broadcast %42 : vector<16x1xf32> to vector<16x32xf32>
    %44 = arith.mulf %39, %43 : vector<16x32xf32>
    %45 = vector.broadcast %25 : vector<1x32xf32> to vector<16x32xf32>
    %46 = arith.mulf %44, %45 : vector<16x32xf32>
    %47 = vector.broadcast %26 : vector<1x32xf32> to vector<16x32xf32>
    %48 = arith.addf %46, %47 : vector<16x32xf32>
    %c0_18 = arith.constant 0 : index
    %c0_19 = arith.constant 0 : index
    %49 = vector.load %arg7[%c0_18, %c0_19] : memref<1x32xf32, #tpu.memory_space<vmem>>, vector<1x32xf32>
    %c0_20 = arith.constant 0 : index
    %c0_21 = arith.constant 0 : index
    %50 = vector.load %arg8[%c0_20, %c0_21] : memref<1x32xf32, #tpu.memory_space<vmem>>, vector<1x32xf32>
    %cst_22 = arith.constant dense<0.000000e+00> : vector<16xf32>
    %51 = vector.multi_reduction <add>, %0, %cst_22 [1] : vector<16x32xf32> to vector<16xf32>
    %52 = vector.shape_cast %51 : vector<16xf32> to vector<16x1xf32>
    %cst_23 = arith.constant 3.200000e+01 : f32
    %53 = vector.broadcast %cst_23 : f32 to vector<16x1xf32>
    %54 = arith.divf %52, %53 : vector<16x1xf32>
    %55 = vector.broadcast %54 : vector<16x1xf32> to vector<16x32xf32>
    %56 = arith.subf %0, %55 : vector<16x32xf32>
    %57 = arith.mulf %56, %56 : vector<16x32xf32>
    %cst_24 = arith.constant dense<0.000000e+00> : vector<16xf32>
    %58 = vector.multi_reduction <add>, %57, %cst_24 [1] : vector<16x32xf32> to vector<16xf32>
    %59 = vector.shape_cast %58 : vector<16xf32> to vector<16x1xf32>
    %cst_25 = arith.constant 3.200000e+01 : f32
    %60 = vector.broadcast %cst_25 : f32 to vector<16x1xf32>
    %61 = arith.divf %59, %60 : vector<16x1xf32>
    %62 = vector.broadcast %54 : vector<16x1xf32> to vector<16x32xf32>
    %63 = arith.subf %0, %62 : vector<16x32xf32>
    %cst_26 = arith.constant 9.99999974E-6 : f32
    %64 = vector.broadcast %cst_26 : f32 to vector<16x1xf32>
    %65 = arith.addf %61, %64 : vector<16x1xf32>
    %66 = math.rsqrt %65 : vector<16x1xf32>
    %67 = vector.broadcast %66 : vector<16x1xf32> to vector<16x32xf32>
    %68 = arith.mulf %63, %67 : vector<16x32xf32>
    %69 = vector.broadcast %49 : vector<1x32xf32> to vector<16x32xf32>
    %70 = arith.mulf %68, %69 : vector<16x32xf32>
    %71 = vector.broadcast %50 : vector<1x32xf32> to vector<16x32xf32>
    %72 = arith.addf %70, %71 : vector<16x32xf32>
    %c0_27 = arith.constant 0 : index
    %c0_28 = arith.constant 0 : index
    %73 = vector.load %arg9[%c0_27, %c0_28] : memref<32x32xf32, #tpu.memory_space<vmem>>, vector<32x32xf32>
    %cst_29 = arith.constant dense<0.000000e+00> : vector<16x32xf32>
    %74 = tpu.matmul %24, %73, %cst_29 {dimension_numbers = #tpu.dot_dimension_numbers<[1], [0], [0], [1], [0, 0, 1, 1], [], []>} : vector<16x32xf32>, vector<32x32xf32>, vector<16x32xf32> -> vector<16x32xf32>
    %c0_30 = arith.constant 0 : index
    %c0_31 = arith.constant 0 : index
    %75 = vector.load %arg10[%c0_30, %c0_31] : memref<1x32xf32, #tpu.memory_space<vmem>>, vector<1x32xf32>
    %76 = vector.broadcast %75 : vector<1x32xf32> to vector<16x32xf32>
    %77 = arith.addf %74, %76 : vector<16x32xf32>
    %c0_32 = arith.constant 0 : index
    %c0_33 = arith.constant 0 : index
    %78 = vector.load %arg11[%c0_32, %c0_33] : memref<32x32xf32, #tpu.memory_space<vmem>>, vector<32x32xf32>
    %cst_34 = arith.constant dense<0.000000e+00> : vector<16x32xf32>
    %79 = tpu.matmul %48, %78, %cst_34 {dimension_numbers = #tpu.dot_dimension_numbers<[1], [0], [0], [1], [0, 0, 1, 1], [], []>} : vector<16x32xf32>, vector<32x32xf32>, vector<16x32xf32> -> vector<16x32xf32>
    %c0_35 = arith.constant 0 : index
    %c0_36 = arith.constant 0 : index
    %80 = vector.load %arg12[%c0_35, %c0_36] : memref<1x32xf32, #tpu.memory_space<vmem>>, vector<1x32xf32>
    %81 = vector.broadcast %80 : vector<1x32xf32> to vector<16x32xf32>
    %82 = arith.addf %79, %81 : vector<16x32xf32>
    %c0_37 = arith.constant 0 : index
    %c0_38 = arith.constant 0 : index
    %83 = vector.load %arg13[%c0_37, %c0_38] : memref<32x32xf32, #tpu.memory_space<vmem>>, vector<32x32xf32>
    %cst_39 = arith.constant dense<0.000000e+00> : vector<16x32xf32>
    %84 = tpu.matmul %72, %83, %cst_39 {dimension_numbers = #tpu.dot_dimension_numbers<[1], [0], [0], [1], [0, 0, 1, 1], [], []>} : vector<16x32xf32>, vector<32x32xf32>, vector<16x32xf32> -> vector<16x32xf32>
    %c0_40 = arith.constant 0 : index
    %c0_41 = arith.constant 0 : index
    %85 = vector.load %arg14[%c0_40, %c0_41] : memref<1x32xf32, #tpu.memory_space<vmem>>, vector<1x32xf32>
    %86 = vector.broadcast %85 : vector<1x32xf32> to vector<16x32xf32>
    %87 = arith.addf %84, %86 : vector<16x32xf32>
    %c0_42 = arith.constant 0 : index
    %c0_43 = arith.constant 0 : index
    %88 = vector.load %arg2[%c0_42, %c0_43] : memref<16x8xf32, #tpu.memory_space<vmem>>, vector<16x8xf32>
    %cst_44 = arith.constant 0.000000e+00 : f32
    %89 = vector.broadcast %cst_44 : f32 to vector<16x8xf32>
    %90 = arith.cmpf ogt, %88, %89 : vector<16x8xf32>
    %91 = vector.extract_strided_slice %77 {offsets = [0, 0], sizes = [8, 32], strides = [1, 1]} : vector<16x32xf32> to vector<8x32xf32>
    %92 = vector.extract_strided_slice %82 {offsets = [0, 0], sizes = [8, 32], strides = [1, 1]} : vector<16x32xf32> to vector<8x32xf32>
    %93 = vector.extract_strided_slice %87 {offsets = [0, 0], sizes = [8, 32], strides = [1, 1]} : vector<16x32xf32> to vector<8x32xf32>
    %94 = vector.extract_strided_slice %90 {offsets = [0, 0], sizes = [8, 8], strides = [1, 1]} : vector<16x8xi1> to vector<8x8xi1>
    %95 = vector.extract_strided_slice %91 {offsets = [0, 0], sizes = [8, 8], strides = [1, 1]} : vector<8x32xf32> to vector<8x8xf32>
    %96 = vector.extract_strided_slice %92 {offsets = [0, 0], sizes = [8, 8], strides = [1, 1]} : vector<8x32xf32> to vector<8x8xf32>
    %cst_45 = arith.constant dense<0.000000e+00> : vector<8x8xf32>
    %97 = tpu.matmul %95, %96, %cst_45 {dimension_numbers = #tpu.dot_dimension_numbers<[1], [1], [0], [0], [0, 0, 1, 0], [], []>} : vector<8x8xf32>, vector<8x8xf32>, vector<8x8xf32> -> vector<8x8xf32>
    %cst_46 = arith.constant 0xFF800000 : f32
    %98 = vector.broadcast %cst_46 : f32 to vector<8x8xf32>
    %99 = arith.select %94, %98, %97 : vector<8x8xi1>, vector<8x8xf32>
    %cst_47 = arith.constant dense<0xFF800000> : vector<8xf32>
    %100 = vector.multi_reduction <maximumf>, %99, %cst_47 [1] : vector<8x8xf32> to vector<8xf32>
    %101 = vector.shape_cast %100 : vector<8xf32> to vector<8x1xf32>
    %102 = vector.broadcast %101 : vector<8x1xf32> to vector<8x8xf32>
    %103 = arith.subf %99, %102 : vector<8x8xf32>
    %104 = math.exp %103 : vector<8x8xf32>
    %cst_48 = arith.constant dense<0.000000e+00> : vector<8xf32>
    %105 = vector.multi_reduction <add>, %104, %cst_48 [1] : vector<8x8xf32> to vector<8xf32>
    %106 = vector.shape_cast %105 : vector<8xf32> to vector<8x1xf32>
    %107 = tpu.reciprocal %106 {approx = true} : vector<8x1xf32> -> vector<8x1xf32>
    %108 = vector.broadcast %107 : vector<8x1xf32> to vector<8x8xf32>
    %109 = arith.mulf %104, %108 : vector<8x8xf32>
    %c0_49 = arith.constant 0 : index
    %c0_50 = arith.constant 0 : index
    %110 = vector.load %arg26[%c0_49, %c0_50] : memref<16x32xf32, #tpu.memory_space<vmem>>, vector<8x8xf32>
    tpu.vector_store %arg26[%c0_49, %c0_50], %109 {strides = array<i32>} : memref<16x32xf32, #tpu.memory_space<vmem>>, vector<8x8xf32>,
    %111 = vector.extract_strided_slice %93 {offsets = [0, 0], sizes = [8, 8], strides = [1, 1]} : vector<8x32xf32> to vector<8x8xf32>
    %cst_51 = arith.constant dense<0.000000e+00> : vector<8x8xf32>
    %112 = tpu.matmul %109, %111, %cst_51 {dimension_numbers = #tpu.dot_dimension_numbers<[1], [0], [0], [1], [0, 0, 1, 1], [], []>} : vector<8x8xf32>, vector<8x8xf32>, vector<8x8xf32> -> vector<8x8xf32>
    %c0_52 = arith.constant 0 : index
    %c0_53 = arith.constant 0 : index
    %113 = vector.load %arg27[%c0_52, %c0_53] : memref<16x32xf32, #tpu.memory_space<vmem>>, vector<8x8xf32>
    tpu.vector_store %arg27[%c0_52, %c0_53], %112 {strides = array<i32>} : memref<16x32xf32, #tpu.memory_space<vmem>>, vector<8x8xf32>,
    %114 = vector.extract_strided_slice %91 {offsets = [0, 8], sizes = [8, 8], strides = [1, 1]} : vector<8x32xf32> to vector<8x8xf32>
    %115 = vector.extract_strided_slice %92 {offsets = [0, 8], sizes = [8, 8], strides = [1, 1]} : vector<8x32xf32> to vector<8x8xf32>
    %cst_54 = arith.constant dense<0.000000e+00> : vector<8x8xf32>
    %116 = tpu.matmul %114, %115, %cst_54 {dimension_numbers = #tpu.dot_dimension_numbers<[1], [1], [0], [0], [0, 0, 1, 0], [], []>} : vector<8x8xf32>, vector<8x8xf32>, vector<8x8xf32> -> vector<8x8xf32>
    %cst_55 = arith.constant 0xFF800000 : f32
    %117 = vector.broadcast %cst_55 : f32 to vector<8x8xf32>
    %118 = arith.select %94, %117, %116 : vector<8x8xi1>, vector<8x8xf32>
    %cst_56 = arith.constant dense<0xFF800000> : vector<8xf32>
    %119 = vector.multi_reduction <maximumf>, %118, %cst_56 [1] : vector<8x8xf32> to vector<8xf32>
    %120 = vector.shape_cast %119 : vector<8xf32> to vector<8x1xf32>
    %121 = vector.broadcast %120 : vector<8x1xf32> to vector<8x8xf32>
    %122 = arith.subf %118, %121 : vector<8x8xf32>
    %123 = math.exp %122 : vector<8x8xf32>
    %cst_57 = arith.constant dense<0.000000e+00> : vector<8xf32>
    %124 = vector.multi_reduction <add>, %123, %cst_57 [1] : vector<8x8xf32> to vector<8xf32>
    %125 = vector.shape_cast %124 : vector<8xf32> to vector<8x1xf32>
    %126 = tpu.reciprocal %125 {approx = true} : vector<8x1xf32> -> vector<8x1xf32>
    %127 = vector.broadcast %126 : vector<8x1xf32> to vector<8x8xf32>
    %128 = arith.mulf %123, %127 : vector<8x8xf32>
    %c0_58 = arith.constant 0 : index
    %c8 = arith.constant 8 : index
    %129 = vector.load %arg26[%c0_58, %c8] : memref<16x32xf32, #tpu.memory_space<vmem>>, vector<8x8xf32>
    tpu.vector_store %arg26[%c0_58, %c8], %128 {strides = array<i32>} : memref<16x32xf32, #tpu.memory_space<vmem>>, vector<8x8xf32>,
    %130 = vector.extract_strided_slice %93 {offsets = [0, 8], sizes = [8, 8], strides = [1, 1]} : vector<8x32xf32> to vector<8x8xf32>
    %cst_59 = arith.constant dense<0.000000e+00> : vector<8x8xf32>
    %131 = tpu.matmul %128, %130, %cst_59 {dimension_numbers = #tpu.dot_dimension_numbers<[1], [0], [0], [1], [0, 0, 1, 1], [], []>} : vector<8x8xf32>, vector<8x8xf32>, vector<8x8xf32> -> vector<8x8xf32>
    %c0_60 = arith.constant 0 : index
    %c8_61 = arith.constant 8 : index
    %132 = vector.load %arg27[%c0_60, %c8_61] : memref<16x32xf32, #tpu.memory_space<vmem>>, vector<8x8xf32>
    tpu.vector_store %arg27[%c0_60, %c8_61], %131 {strides = array<i32>} : memref<16x32xf32, #tpu.memory_space<vmem>>, vector<8x8xf32>,
    %133 = vector.extract_strided_slice %91 {offsets = [0, 16], sizes = [8, 8], strides = [1, 1]} : vector<8x32xf32> to vector<8x8xf32>
    %134 = vector.extract_strided_slice %92 {offsets = [0, 16], sizes = [8, 8], strides = [1, 1]} : vector<8x32xf32> to vector<8x8xf32>
    %cst_62 = arith.constant dense<0.000000e+00> : vector<8x8xf32>
    %135 = tpu.matmul %133, %134, %cst_62 {dimension_numbers = #tpu.dot_dimension_numbers<[1], [1], [0], [0], [0, 0, 1, 0], [], []>} : vector<8x8xf32>, vector<8x8xf32>, vector<8x8xf32> -> vector<8x8xf32>
    %cst_63 = arith.constant 0xFF800000 : f32
    %136 = vector.broadcast %cst_63 : f32 to vector<8x8xf32>
    %137 = arith.select %94, %136, %135 : vector<8x8xi1>, vector<8x8xf32>
    %cst_64 = arith.constant dense<0xFF800000> : vector<8xf32>
    %138 = vector.multi_reduction <maximumf>, %137, %cst_64 [1] : vector<8x8xf32> to vector<8xf32>
    %139 = vector.shape_cast %138 : vector<8xf32> to vector<8x1xf32>
    %140 = vector.broadcast %139 : vector<8x1xf32> to vector<8x8xf32>
    %141 = arith.subf %137, %140 : vector<8x8xf32>
    %142 = math.exp %141 : vector<8x8xf32>
    %cst_65 = arith.constant dense<0.000000e+00> : vector<8xf32>
    %143 = vector.multi_reduction <add>, %142, %cst_65 [1] : vector<8x8xf32> to vector<8xf32>
    %144 = vector.shape_cast %143 : vector<8xf32> to vector<8x1xf32>
    %145 = tpu.reciprocal %144 {approx = true} : vector<8x1xf32> -> vector<8x1xf32>
    %146 = vector.broadcast %145 : vector<8x1xf32> to vector<8x8xf32>
    %147 = arith.mulf %142, %146 : vector<8x8xf32>
    %c0_66 = arith.constant 0 : index
    %c16 = arith.constant 16 : index
    %148 = vector.load %arg26[%c0_66, %c16] : memref<16x32xf32, #tpu.memory_space<vmem>>, vector<8x8xf32>
    tpu.vector_store %arg26[%c0_66, %c16], %147 {strides = array<i32>} : memref<16x32xf32, #tpu.memory_space<vmem>>, vector<8x8xf32>,
    %149 = vector.extract_strided_slice %93 {offsets = [0, 16], sizes = [8, 8], strides = [1, 1]} : vector<8x32xf32> to vector<8x8xf32>
    %cst_67 = arith.constant dense<0.000000e+00> : vector<8x8xf32>
    %150 = tpu.matmul %147, %149, %cst_67 {dimension_numbers = #tpu.dot_dimension_numbers<[1], [0], [0], [1], [0, 0, 1, 1], [], []>} : vector<8x8xf32>, vector<8x8xf32>, vector<8x8xf32> -> vector<8x8xf32>
    %c0_68 = arith.constant 0 : index
    %c16_69 = arith.constant 16 : index
    %151 = vector.load %arg27[%c0_68, %c16_69] : memref<16x32xf32, #tpu.memory_space<vmem>>, vector<8x8xf32>
    tpu.vector_store %arg27[%c0_68, %c16_69], %150 {strides = array<i32>} : memref<16x32xf32, #tpu.memory_space<vmem>>, vector<8x8xf32>,
    %152 = vector.extract_strided_slice %91 {offsets = [0, 24], sizes = [8, 8], strides = [1, 1]} : vector<8x32xf32> to vector<8x8xf32>
    %153 = vector.extract_strided_slice %92 {offsets = [0, 24], sizes = [8, 8], strides = [1, 1]} : vector<8x32xf32> to vector<8x8xf32>
    %cst_70 = arith.constant dense<0.000000e+00> : vector<8x8xf32>
    %154 = tpu.matmul %152, %153, %cst_70 {dimension_numbers = #tpu.dot_dimension_numbers<[1], [1], [0], [0], [0, 0, 1, 0], [], []>} : vector<8x8xf32>, vector<8x8xf32>, vector<8x8xf32> -> vector<8x8xf32>
    %cst_71 = arith.constant 0xFF800000 : f32
    %155 = vector.broadcast %cst_71 : f32 to vector<8x8xf32>
    %156 = arith.select %94, %155, %154 : vector<8x8xi1>, vector<8x8xf32>
    %cst_72 = arith.constant dense<0xFF800000> : vector<8xf32>
    %157 = vector.multi_reduction <maximumf>, %156, %cst_72 [1] : vector<8x8xf32> to vector<8xf32>
    %158 = vector.shape_cast %157 : vector<8xf32> to vector<8x1xf32>
    %159 = vector.broadcast %158 : vector<8x1xf32> to vector<8x8xf32>
    %160 = arith.subf %156, %159 : vector<8x8xf32>
    %161 = math.exp %160 : vector<8x8xf32>
    %cst_73 = arith.constant dense<0.000000e+00> : vector<8xf32>
    %162 = vector.multi_reduction <add>, %161, %cst_73 [1] : vector<8x8xf32> to vector<8xf32>
    %163 = vector.shape_cast %162 : vector<8xf32> to vector<8x1xf32>
    %164 = tpu.reciprocal %163 {approx = true} : vector<8x1xf32> -> vector<8x1xf32>
    %165 = vector.broadcast %164 : vector<8x1xf32> to vector<8x8xf32>
    %166 = arith.mulf %161, %165 : vector<8x8xf32>
    %c0_74 = arith.constant 0 : index
    %c24 = arith.constant 24 : index
    %167 = vector.load %arg26[%c0_74, %c24] : memref<16x32xf32, #tpu.memory_space<vmem>>, vector<8x8xf32>
    tpu.vector_store %arg26[%c0_74, %c24], %166 {strides = array<i32>} : memref<16x32xf32, #tpu.memory_space<vmem>>, vector<8x8xf32>,
    %168 = vector.extract_strided_slice %93 {offsets = [0, 24], sizes = [8, 8], strides = [1, 1]} : vector<8x32xf32> to vector<8x8xf32>
    %cst_75 = arith.constant dense<0.000000e+00> : vector<8x8xf32>
    %169 = tpu.matmul %166, %168, %cst_75 {dimension_numbers = #tpu.dot_dimension_numbers<[1], [0], [0], [1], [0, 0, 1, 1], [], []>} : vector<8x8xf32>, vector<8x8xf32>, vector<8x8xf32> -> vector<8x8xf32>
    %c0_76 = arith.constant 0 : index
    %c24_77 = arith.constant 24 : index
    %170 = vector.load %arg27[%c0_76, %c24_77] : memref<16x32xf32, #tpu.memory_space<vmem>>, vector<8x8xf32>
    tpu.vector_store %arg27[%c0_76, %c24_77], %169 {strides = array<i32>} : memref<16x32xf32, #tpu.memory_space<vmem>>, vector<8x8xf32>,
    %171 = vector.extract_strided_slice %77 {offsets = [8, 0], sizes = [8, 32], strides = [1, 1]} : vector<16x32xf32> to vector<8x32xf32>
    %172 = vector.extract_strided_slice %82 {offsets = [8, 0], sizes = [8, 32], strides = [1, 1]} : vector<16x32xf32> to vector<8x32xf32>
    %173 = vector.extract_strided_slice %87 {offsets = [8, 0], sizes = [8, 32], strides = [1, 1]} : vector<16x32xf32> to vector<8x32xf32>
    %174 = vector.extract_strided_slice %90 {offsets = [8, 0], sizes = [8, 8], strides = [1, 1]} : vector<16x8xi1> to vector<8x8xi1>
    %175 = vector.extract_strided_slice %171 {offsets = [0, 0], sizes = [8, 8], strides = [1, 1]} : vector<8x32xf32> to vector<8x8xf32>
    %176 = vector.extract_strided_slice %172 {offsets = [0, 0], sizes = [8, 8], strides = [1, 1]} : vector<8x32xf32> to vector<8x8xf32>
    %cst_78 = arith.constant dense<0.000000e+00> : vector<8x8xf32>
    %177 = tpu.matmul %175, %176, %cst_78 {dimension_numbers = #tpu.dot_dimension_numbers<[1], [1], [0], [0], [0, 0, 1, 0], [], []>} : vector<8x8xf32>, vector<8x8xf32>, vector<8x8xf32> -> vector<8x8xf32>
    %cst_79 = arith.constant 0xFF800000 : f32
    %178 = vector.broadcast %cst_79 : f32 to vector<8x8xf32>
    %179 = arith.select %174, %178, %177 : vector<8x8xi1>, vector<8x8xf32>
    %cst_80 = arith.constant dense<0xFF800000> : vector<8xf32>
    %180 = vector.multi_reduction <maximumf>, %179, %cst_80 [1] : vector<8x8xf32> to vector<8xf32>
    %181 = vector.shape_cast %180 : vector<8xf32> to vector<8x1xf32>
    %182 = vector.broadcast %181 : vector<8x1xf32> to vector<8x8xf32>
    %183 = arith.subf %179, %182 : vector<8x8xf32>
    %184 = math.exp %183 : vector<8x8xf32>
    %cst_81 = arith.constant dense<0.000000e+00> : vector<8xf32>
    %185 = vector.multi_reduction <add>, %184, %cst_81 [1] : vector<8x8xf32> to vector<8xf32>
    %186 = vector.shape_cast %185 : vector<8xf32> to vector<8x1xf32>
    %187 = tpu.reciprocal %186 {approx = true} : vector<8x1xf32> -> vector<8x1xf32>
    %188 = vector.broadcast %187 : vector<8x1xf32> to vector<8x8xf32>
    %189 = arith.mulf %184, %188 : vector<8x8xf32>
    %c8_82 = arith.constant 8 : index
    %c0_83 = arith.constant 0 : index
    %190 = vector.load %arg26[%c8_82, %c0_83] : memref<16x32xf32, #tpu.memory_space<vmem>>, vector<8x8xf32>
    tpu.vector_store %arg26[%c8_82, %c0_83], %189 {strides = array<i32>} : memref<16x32xf32, #tpu.memory_space<vmem>>, vector<8x8xf32>,
    %191 = vector.extract_strided_slice %173 {offsets = [0, 0], sizes = [8, 8], strides = [1, 1]} : vector<8x32xf32> to vector<8x8xf32>
    %cst_84 = arith.constant dense<0.000000e+00> : vector<8x8xf32>
    %192 = tpu.matmul %189, %191, %cst_84 {dimension_numbers = #tpu.dot_dimension_numbers<[1], [0], [0], [1], [0, 0, 1, 1], [], []>} : vector<8x8xf32>, vector<8x8xf32>, vector<8x8xf32> -> vector<8x8xf32>
    %c8_85 = arith.constant 8 : index
    %c0_86 = arith.constant 0 : index
    %193 = vector.load %arg27[%c8_85, %c0_86] : memref<16x32xf32, #tpu.memory_space<vmem>>, vector<8x8xf32>
    tpu.vector_store %arg27[%c8_85, %c0_86], %192 {strides = array<i32>} : memref<16x32xf32, #tpu.memory_space<vmem>>, vector<8x8xf32>,
    %194 = vector.extract_strided_slice %171 {offsets = [0, 8], sizes = [8, 8], strides = [1, 1]} : vector<8x32xf32> to vector<8x8xf32>
    %195 = vector.extract_strided_slice %172 {offsets = [0, 8], sizes = [8, 8], strides = [1, 1]} : vector<8x32xf32> to vector<8x8xf32>
    %cst_87 = arith.constant dense<0.000000e+00> : vector<8x8xf32>
    %196 = tpu.matmul %194, %195, %cst_87 {dimension_numbers = #tpu.dot_dimension_numbers<[1], [1], [0], [0], [0, 0, 1, 0], [], []>} : vector<8x8xf32>, vector<8x8xf32>, vector<8x8xf32> -> vector<8x8xf32>
    %cst_88 = arith.constant 0xFF800000 : f32
    %197 = vector.broadcast %cst_88 : f32 to vector<8x8xf32>
    %198 = arith.select %174, %197, %196 : vector<8x8xi1>, vector<8x8xf32>
    %cst_89 = arith.constant dense<0xFF800000> : vector<8xf32>
    %199 = vector.multi_reduction <maximumf>, %198, %cst_89 [1] : vector<8x8xf32> to vector<8xf32>
    %200 = vector.shape_cast %199 : vector<8xf32> to vector<8x1xf32>
    %201 = vector.broadcast %200 : vector<8x1xf32> to vector<8x8xf32>
    %202 = arith.subf %198, %201 : vector<8x8xf32>
    %203 = math.exp %202 : vector<8x8xf32>
    %cst_90 = arith.constant dense<0.000000e+00> : vector<8xf32>
    %204 = vector.multi_reduction <add>, %203, %cst_90 [1] : vector<8x8xf32> to vector<8xf32>
    %205 = vector.shape_cast %204 : vector<8xf32> to vector<8x1xf32>
    %206 = tpu.reciprocal %205 {approx = true} : vector<8x1xf32> -> vector<8x1xf32>
    %207 = vector.broadcast %206 : vector<8x1xf32> to vector<8x8xf32>
    %208 = arith.mulf %203, %207 : vector<8x8xf32>
    %c8_91 = arith.constant 8 : index
    %c8_92 = arith.constant 8 : index
    %209 = vector.load %arg26[%c8_91, %c8_92] : memref<16x32xf32, #tpu.memory_space<vmem>>, vector<8x8xf32>
    tpu.vector_store %arg26[%c8_91, %c8_92], %208 {strides = array<i32>} : memref<16x32xf32, #tpu.memory_space<vmem>>, vector<8x8xf32>,
    %210 = vector.extract_strided_slice %173 {offsets = [0, 8], sizes = [8, 8], strides = [1, 1]} : vector<8x32xf32> to vector<8x8xf32>
    %cst_93 = arith.constant dense<0.000000e+00> : vector<8x8xf32>
    %211 = tpu.matmul %208, %210, %cst_93 {dimension_numbers = #tpu.dot_dimension_numbers<[1], [0], [0], [1], [0, 0, 1, 1], [], []>} : vector<8x8xf32>, vector<8x8xf32>, vector<8x8xf32> -> vector<8x8xf32>
    %c8_94 = arith.constant 8 : index
    %c8_95 = arith.constant 8 : index
    %212 = vector.load %arg27[%c8_94, %c8_95] : memref<16x32xf32, #tpu.memory_space<vmem>>, vector<8x8xf32>
    tpu.vector_store %arg27[%c8_94, %c8_95], %211 {strides = array<i32>} : memref<16x32xf32, #tpu.memory_space<vmem>>, vector<8x8xf32>,
    %213 = vector.extract_strided_slice %171 {offsets = [0, 16], sizes = [8, 8], strides = [1, 1]} : vector<8x32xf32> to vector<8x8xf32>
    %214 = vector.extract_strided_slice %172 {offsets = [0, 16], sizes = [8, 8], strides = [1, 1]} : vector<8x32xf32> to vector<8x8xf32>
    %cst_96 = arith.constant dense<0.000000e+00> : vector<8x8xf32>
    %215 = tpu.matmul %213, %214, %cst_96 {dimension_numbers = #tpu.dot_dimension_numbers<[1], [1], [0], [0], [0, 0, 1, 0], [], []>} : vector<8x8xf32>, vector<8x8xf32>, vector<8x8xf32> -> vector<8x8xf32>
    %cst_97 = arith.constant 0xFF800000 : f32
    %216 = vector.broadcast %cst_97 : f32 to vector<8x8xf32>
    %217 = arith.select %174, %216, %215 : vector<8x8xi1>, vector<8x8xf32>
    %cst_98 = arith.constant dense<0xFF800000> : vector<8xf32>
    %218 = vector.multi_reduction <maximumf>, %217, %cst_98 [1] : vector<8x8xf32> to vector<8xf32>
    %219 = vector.shape_cast %218 : vector<8xf32> to vector<8x1xf32>
    %220 = vector.broadcast %219 : vector<8x1xf32> to vector<8x8xf32>
    %221 = arith.subf %217, %220 : vector<8x8xf32>
    %222 = math.exp %221 : vector<8x8xf32>
    %cst_99 = arith.constant dense<0.000000e+00> : vector<8xf32>
    %223 = vector.multi_reduction <add>, %222, %cst_99 [1] : vector<8x8xf32> to vector<8xf32>
    %224 = vector.shape_cast %223 : vector<8xf32> to vector<8x1xf32>
    %225 = tpu.reciprocal %224 {approx = true} : vector<8x1xf32> -> vector<8x1xf32>
    %226 = vector.broadcast %225 : vector<8x1xf32> to vector<8x8xf32>
    %227 = arith.mulf %222, %226 : vector<8x8xf32>
    %c8_100 = arith.constant 8 : index
    %c16_101 = arith.constant 16 : index
    %228 = vector.load %arg26[%c8_100, %c16_101] : memref<16x32xf32, #tpu.memory_space<vmem>>, vector<8x8xf32>
    tpu.vector_store %arg26[%c8_100, %c16_101], %227 {strides = array<i32>} : memref<16x32xf32, #tpu.memory_space<vmem>>, vector<8x8xf32>,
    %229 = vector.extract_strided_slice %173 {offsets = [0, 16], sizes = [8, 8], strides = [1, 1]} : vector<8x32xf32> to vector<8x8xf32>
    %cst_102 = arith.constant dense<0.000000e+00> : vector<8x8xf32>
    %230 = tpu.matmul %227, %229, %cst_102 {dimension_numbers = #tpu.dot_dimension_numbers<[1], [0], [0], [1], [0, 0, 1, 1], [], []>} : vector<8x8xf32>, vector<8x8xf32>, vector<8x8xf32> -> vector<8x8xf32>
    %c8_103 = arith.constant 8 : index
    %c16_104 = arith.constant 16 : index
    %231 = vector.load %arg27[%c8_103, %c16_104] : memref<16x32xf32, #tpu.memory_space<vmem>>, vector<8x8xf32>
    tpu.vector_store %arg27[%c8_103, %c16_104], %230 {strides = array<i32>} : memref<16x32xf32, #tpu.memory_space<vmem>>, vector<8x8xf32>,
    %232 = vector.extract_strided_slice %171 {offsets = [0, 24], sizes = [8, 8], strides = [1, 1]} : vector<8x32xf32> to vector<8x8xf32>
    %233 = vector.extract_strided_slice %172 {offsets = [0, 24], sizes = [8, 8], strides = [1, 1]} : vector<8x32xf32> to vector<8x8xf32>
    %cst_105 = arith.constant dense<0.000000e+00> : vector<8x8xf32>
    %234 = tpu.matmul %232, %233, %cst_105 {dimension_numbers = #tpu.dot_dimension_numbers<[1], [1], [0], [0], [0, 0, 1, 0], [], []>} : vector<8x8xf32>, vector<8x8xf32>, vector<8x8xf32> -> vector<8x8xf32>
    %cst_106 = arith.constant 0xFF800000 : f32
    %235 = vector.broadcast %cst_106 : f32 to vector<8x8xf32>
    %236 = arith.select %174, %235, %234 : vector<8x8xi1>, vector<8x8xf32>
    %cst_107 = arith.constant dense<0xFF800000> : vector<8xf32>
    %237 = vector.multi_reduction <maximumf>, %236, %cst_107 [1] : vector<8x8xf32> to vector<8xf32>
    %238 = vector.shape_cast %237 : vector<8xf32> to vector<8x1xf32>
    %239 = vector.broadcast %238 : vector<8x1xf32> to vector<8x8xf32>
    %240 = arith.subf %236, %239 : vector<8x8xf32>
    %241 = math.exp %240 : vector<8x8xf32>
    %cst_108 = arith.constant dense<0.000000e+00> : vector<8xf32>
    %242 = vector.multi_reduction <add>, %241, %cst_108 [1] : vector<8x8xf32> to vector<8xf32>
    %243 = vector.shape_cast %242 : vector<8xf32> to vector<8x1xf32>
    %244 = tpu.reciprocal %243 {approx = true} : vector<8x1xf32> -> vector<8x1xf32>
    %245 = vector.broadcast %244 : vector<8x1xf32> to vector<8x8xf32>
    %246 = arith.mulf %241, %245 : vector<8x8xf32>
    %c8_109 = arith.constant 8 : index
    %c24_110 = arith.constant 24 : index
    %247 = vector.load %arg26[%c8_109, %c24_110] : memref<16x32xf32, #tpu.memory_space<vmem>>, vector<8x8xf32>
    tpu.vector_store %arg26[%c8_109, %c24_110], %246 {strides = array<i32>} : memref<16x32xf32, #tpu.memory_space<vmem>>, vector<8x8xf32>,
    %248 = vector.extract_strided_slice %173 {offsets = [0, 24], sizes = [8, 8], strides = [1, 1]} : vector<8x32xf32> to vector<8x8xf32>
    %cst_111 = arith.constant dense<0.000000e+00> : vector<8x8xf32>
    %249 = tpu.matmul %246, %248, %cst_111 {dimension_numbers = #tpu.dot_dimension_numbers<[1], [0], [0], [1], [0, 0, 1, 1], [], []>} : vector<8x8xf32>, vector<8x8xf32>, vector<8x8xf32> -> vector<8x8xf32>
    %c8_112 = arith.constant 8 : index
    %c24_113 = arith.constant 24 : index
    %250 = vector.load %arg27[%c8_112, %c24_113] : memref<16x32xf32, #tpu.memory_space<vmem>>, vector<8x8xf32>
    tpu.vector_store %arg27[%c8_112, %c24_113], %249 {strides = array<i32>} : memref<16x32xf32, #tpu.memory_space<vmem>>, vector<8x8xf32>,
    %c0_114 = arith.constant 0 : index
    %c0_115 = arith.constant 0 : index
    %251 = vector.load %arg27[%c0_114, %c0_115] : memref<16x32xf32, #tpu.memory_space<vmem>>, vector<16x32xf32>
    %c0_116 = arith.constant 0 : index
    %c0_117 = arith.constant 0 : index
    %252 = vector.load %arg15[%c0_116, %c0_117] : memref<32x32xf32, #tpu.memory_space<vmem>>, vector<32x32xf32>
    %cst_118 = arith.constant dense<0.000000e+00> : vector<16x32xf32>
    %253 = tpu.matmul %251, %252, %cst_118 {dimension_numbers = #tpu.dot_dimension_numbers<[1], [0], [0], [1], [0, 0, 1, 1], [], []>} : vector<16x32xf32>, vector<32x32xf32>, vector<16x32xf32> -> vector<16x32xf32>
    %c0_119 = arith.constant 0 : index
    %c0_120 = arith.constant 0 : index
    %254 = vector.load %arg16[%c0_119, %c0_120] : memref<1x32xf32, #tpu.memory_space<vmem>>, vector<1x32xf32>
    %255 = vector.broadcast %254 : vector<1x32xf32> to vector<16x32xf32>
    %256 = arith.addf %253, %255 : vector<16x32xf32>
    %257 = arith.addf %256, %24 : vector<16x32xf32>
    %c0_121 = arith.constant 0 : index
    %c0_122 = arith.constant 0 : index
    %258 = vector.load %arg17[%c0_121, %c0_122] : memref<1x32xf32, #tpu.memory_space<vmem>>, vector<1x32xf32>
    %c0_123 = arith.constant 0 : index
    %c0_124 = arith.constant 0 : index
    %259 = vector.load %arg18[%c0_123, %c0_124] : memref<1x32xf32, #tpu.memory_space<vmem>>, vector<1x32xf32>
    %cst_125 = arith.constant dense<0.000000e+00> : vector<16xf32>
    %260 = vector.multi_reduction <add>, %257, %cst_125 [1] : vector<16x32xf32> to vector<16xf32>
    %261 = vector.shape_cast %260 : vector<16xf32> to vector<16x1xf32>
    %cst_126 = arith.constant 3.200000e+01 : f32
    %262 = vector.broadcast %cst_126 : f32 to vector<16x1xf32>
    %263 = arith.divf %261, %262 : vector<16x1xf32>
    %264 = vector.broadcast %263 : vector<16x1xf32> to vector<16x32xf32>
    %265 = arith.subf %257, %264 : vector<16x32xf32>
    %266 = arith.mulf %265, %265 : vector<16x32xf32>
    %cst_127 = arith.constant dense<0.000000e+00> : vector<16xf32>
    %267 = vector.multi_reduction <add>, %266, %cst_127 [1] : vector<16x32xf32> to vector<16xf32>
    %268 = vector.shape_cast %267 : vector<16xf32> to vector<16x1xf32>
    %cst_128 = arith.constant 3.200000e+01 : f32
    %269 = vector.broadcast %cst_128 : f32 to vector<16x1xf32>
    %270 = arith.divf %268, %269 : vector<16x1xf32>
    %271 = vector.broadcast %263 : vector<16x1xf32> to vector<16x32xf32>
    %272 = arith.subf %257, %271 : vector<16x32xf32>
    %cst_129 = arith.constant 9.99999974E-6 : f32
    %273 = vector.broadcast %cst_129 : f32 to vector<16x1xf32>
    %274 = arith.addf %270, %273 : vector<16x1xf32>
    %275 = math.rsqrt %274 : vector<16x1xf32>
    %276 = vector.broadcast %275 : vector<16x1xf32> to vector<16x32xf32>
    %277 = arith.mulf %272, %276 : vector<16x32xf32>
    %278 = vector.broadcast %258 : vector<1x32xf32> to vector<16x32xf32>
    %279 = arith.mulf %277, %278 : vector<16x32xf32>
    %280 = vector.broadcast %259 : vector<1x32xf32> to vector<16x32xf32>
    %281 = arith.addf %279, %280 : vector<16x32xf32>
    %cst_130 = arith.constant 0.000000e+00 : f32
    %282 = vector.broadcast %cst_130 : f32 to vector<16x32xf32>
    %283 = arith.maximumf %281, %282 : vector<16x32xf32>
    %284 = vector.broadcast %cst_130 : f32 to vector<16x32xf32>
    %285 = arith.subf %281, %284 : vector<16x32xf32>
    %286 = arith.cmpf one, %285, %285 : vector<16x32xf32>
    %287 = vector.broadcast %cst_130 : f32 to vector<16x32xf32>
    %288 = arith.addf %281, %287 : vector<16x32xf32>
    %289 = math.absf %285 : vector<16x32xf32>
    %cst_131 = arith.constant 0.000000e+00 : f32
    %290 = vector.broadcast %cst_131 : f32 to vector<16x32xf32>
    %291 = arith.subf %290, %289 : vector<16x32xf32>
    %292 = math.exp %291 : vector<16x32xf32>
    %293 = math.log1p %292 : vector<16x32xf32>
    %294 = arith.addf %283, %293 : vector<16x32xf32>
    %295 = arith.select %286, %288, %294 : vector<16x32xi1>, vector<16x32xf32>
    %296 = math.tanh %295 : vector<16x32xf32>
    %297 = arith.mulf %281, %296 : vector<16x32xf32>
    %c0_132 = arith.constant 0 : index
    %c0_133 = arith.constant 0 : index
    %298 = vector.load %arg19[%c0_132, %c0_133] : memref<32x64xf32, #tpu.memory_space<vmem>>, vector<32x64xf32>
    %cst_134 = arith.constant dense<0.000000e+00> : vector<16x64xf32>
    %299 = tpu.matmul %297, %298, %cst_134 {dimension_numbers = #tpu.dot_dimension_numbers<[1], [0], [0], [1], [0, 0, 1, 1], [], []>} : vector<16x32xf32>, vector<32x64xf32>, vector<16x64xf32> -> vector<16x64xf32>
    %c0_135 = arith.constant 0 : index
    %c0_136 = arith.constant 0 : index
    %300 = vector.load %arg20[%c0_135, %c0_136] : memref<1x64xf32, #tpu.memory_space<vmem>>, vector<1x64xf32>
    %301 = vector.broadcast %300 : vector<1x64xf32> to vector<16x64xf32>
    %302 = arith.addf %299, %301 : vector<16x64xf32>
    %cst_137 = arith.constant 0.000000e+00 : f32
    %303 = vector.broadcast %cst_137 : f32 to vector<16x64xf32>
    %304 = arith.maximumf %302, %303 : vector<16x64xf32>
    %305 = vector.broadcast %cst_137 : f32 to vector<16x64xf32>
    %306 = arith.subf %302, %305 : vector<16x64xf32>
    %307 = arith.cmpf one, %306, %306 : vector<16x64xf32>
    %308 = vector.broadcast %cst_137 : f32 to vector<16x64xf32>
    %309 = arith.addf %302, %308 : vector<16x64xf32>
    %310 = math.absf %306 : vector<16x64xf32>
    %cst_138 = arith.constant 0.000000e+00 : f32
    %311 = vector.broadcast %cst_138 : f32 to vector<16x64xf32>
    %312 = arith.subf %311, %310 : vector<16x64xf32>
    %313 = math.exp %312 : vector<16x64xf32>
    %314 = math.log1p %313 : vector<16x64xf32>
    %315 = arith.addf %304, %314 : vector<16x64xf32>
    %316 = arith.select %307, %309, %315 : vector<16x64xi1>, vector<16x64xf32>
    %317 = math.tanh %316 : vector<16x64xf32>
    %318 = arith.mulf %302, %317 : vector<16x64xf32>
    %c0_139 = arith.constant 0 : index
    %c0_140 = arith.constant 0 : index
    %319 = vector.load %arg21[%c0_139, %c0_140] : memref<64x32xf32, #tpu.memory_space<vmem>>, vector<64x32xf32>
    %cst_141 = arith.constant dense<0.000000e+00> : vector<16x32xf32>
    %320 = tpu.matmul %318, %319, %cst_141 {dimension_numbers = #tpu.dot_dimension_numbers<[1], [0], [0], [1], [0, 0, 1, 1], [], []>} : vector<16x64xf32>, vector<64x32xf32>, vector<16x32xf32> -> vector<16x32xf32>
    %c0_142 = arith.constant 0 : index
    %c0_143 = arith.constant 0 : index
    %321 = vector.load %arg22[%c0_142, %c0_143] : memref<1x32xf32, #tpu.memory_space<vmem>>, vector<1x32xf32>
    %322 = vector.broadcast %321 : vector<1x32xf32> to vector<16x32xf32>
    %323 = arith.addf %320, %322 : vector<16x32xf32>
    %cst_144 = arith.constant 0.000000e+00 : f32
    %324 = vector.broadcast %cst_144 : f32 to vector<16x32xf32>
    %325 = arith.maximumf %323, %324 : vector<16x32xf32>
    %326 = vector.broadcast %cst_144 : f32 to vector<16x32xf32>
    %327 = arith.subf %323, %326 : vector<16x32xf32>
    %328 = arith.cmpf one, %327, %327 : vector<16x32xf32>
    %329 = vector.broadcast %cst_144 : f32 to vector<16x32xf32>
    %330 = arith.addf %323, %329 : vector<16x32xf32>
    %331 = math.absf %327 : vector<16x32xf32>
    %cst_145 = arith.constant 0.000000e+00 : f32
    %332 = vector.broadcast %cst_145 : f32 to vector<16x32xf32>
    %333 = arith.subf %332, %331 : vector<16x32xf32>
    %334 = math.exp %333 : vector<16x32xf32>
    %335 = math.log1p %334 : vector<16x32xf32>
    %336 = arith.addf %325, %335 : vector<16x32xf32>
    %337 = arith.select %328, %330, %336 : vector<16x32xi1>, vector<16x32xf32>
    %338 = math.tanh %337 : vector<16x32xf32>
    %339 = arith.mulf %323, %338 : vector<16x32xf32>
    %340 = arith.addf %281, %339 : vector<16x32xf32>
    %c0_146 = arith.constant 0 : index
    %c0_147 = arith.constant 0 : index
    %341 = vector.load %arg23[%c0_146, %c0_147] : memref<1x32xf32, #tpu.memory_space<vmem>>, vector<1x32xf32>
    %c0_148 = arith.constant 0 : index
    %c0_149 = arith.constant 0 : index
    %342 = vector.load %arg24[%c0_148, %c0_149] : memref<1x32xf32, #tpu.memory_space<vmem>>, vector<1x32xf32>
    %cst_150 = arith.constant dense<0.000000e+00> : vector<16xf32>
    %343 = vector.multi_reduction <add>, %340, %cst_150 [1] : vector<16x32xf32> to vector<16xf32>
    %344 = vector.shape_cast %343 : vector<16xf32> to vector<16x1xf32>
    %cst_151 = arith.constant 3.200000e+01 : f32
    %345 = vector.broadcast %cst_151 : f32 to vector<16x1xf32>
    %346 = arith.divf %344, %345 : vector<16x1xf32>
    %347 = vector.broadcast %346 : vector<16x1xf32> to vector<16x32xf32>
    %348 = arith.subf %340, %347 : vector<16x32xf32>
    %349 = arith.mulf %348, %348 : vector<16x32xf32>
    %cst_152 = arith.constant dense<0.000000e+00> : vector<16xf32>
    %350 = vector.multi_reduction <add>, %349, %cst_152 [1] : vector<16x32xf32> to vector<16xf32>
    %351 = vector.shape_cast %350 : vector<16xf32> to vector<16x1xf32>
    %cst_153 = arith.constant 3.200000e+01 : f32
    %352 = vector.broadcast %cst_153 : f32 to vector<16x1xf32>
    %353 = arith.divf %351, %352 : vector<16x1xf32>
    %354 = vector.broadcast %346 : vector<16x1xf32> to vector<16x32xf32>
    %355 = arith.subf %340, %354 : vector<16x32xf32>
    %cst_154 = arith.constant 9.99999974E-6 : f32
    %356 = vector.broadcast %cst_154 : f32 to vector<16x1xf32>
    %357 = arith.addf %353, %356 : vector<16x1xf32>
    %358 = math.rsqrt %357 : vector<16x1xf32>
    %359 = vector.broadcast %358 : vector<16x1xf32> to vector<16x32xf32>
    %360 = arith.mulf %355, %359 : vector<16x32xf32>
    %361 = vector.broadcast %341 : vector<1x32xf32> to vector<16x32xf32>
    %362 = arith.mulf %360, %361 : vector<16x32xf32>
    %363 = vector.broadcast %342 : vector<1x32xf32> to vector<16x32xf32>
    %364 = arith.addf %362, %363 : vector<16x32xf32>
    %365 = arith.addf %364, %281 : vector<16x32xf32>
    %c0_155 = arith.constant 0 : index
    %c0_156 = arith.constant 0 : index
    %366 = vector.load %arg25[%c0_155, %c0_156] : memref<16x32xf32, #tpu.memory_space<vmem>>, vector<16x32xf32>
    tpu.vector_store %arg25[%c0_155, %c0_156], %365 {strides = array<i32>} : memref<16x32xf32, #tpu.memory_space<vmem>>, vector<16x32xf32>,
    return
  }
  func.func @transform_0(%arg0: i32) -> (i32, i32) {
    %c0_i32 = arith.constant 0 : i32
    %c0_i32_0 = arith.constant 0 : i32
    return %arg0, %c0_i32 : i32, i32
  }
  func.func @transform_1(%arg0: i32) -> (i32, i32) {
    %c0_i32 = arith.constant 0 : i32
    %c0_i32_0 = arith.constant 0 : i32
    return %arg0, %c0_i32 : i32, i32
  }
  func.func @transform_2(%arg0: i32) -> (i32, i32) {
    %c0_i32 = arith.constant 0 : i32
    %c0_i32_0 = arith.constant 0 : i32
    %c0_i32_1 = arith.constant 0 : i32
    return %c0_i32, %c0_i32_0 : i32, i32
  }
  func.func @transform_3(%arg0: i32) -> (i32, i32) {
    %c0_i32 = arith.constant 0 : i32
    %c0_i32_0 = arith.constant 0 : i32
    %c0_i32_1 = arith.constant 0 : i32
    return %c0_i32, %c0_i32_0 : i32, i32
  }
  func.func @transform_4(%arg0: i32) -> (i32, i32) {
    %c0_i32 = arith.constant 0 : i32
    %c0_i32_0 = arith.constant 0 : i32
    %c0_i32_1 = arith.constant 0 : i32
    return %c0_i32, %c0_i32_0 : i32, i32
  }
  func.func @transform_5(%arg0: i32) -> (i32, i32) {
    %c0_i32 = arith.constant 0 : i32
    %c0_i32_0 = arith.constant 0 : i32
    %c0_i32_1 = arith.constant 0 : i32
    return %c0_i32, %c0_i32_0 : i32, i32
  }
  func.func @transform_6(%arg0: i32) -> (i32, i32) {
    %c0_i32 = arith.constant 0 : i32
    %c0_i32_0 = arith.constant 0 : i32
    %c0_i32_1 = arith.constant 0 : i32
    return %c0_i32, %c0_i32_0 : i32, i32
  }
  func.func @transform_7(%arg0: i32) -> (i32, i32) {
    %c0_i32 = arith.constant 0 : i32
    %c0_i32_0 = arith.constant 0 : i32
    %c0_i32_1 = arith.constant 0 : i32
    return %c0_i32, %c0_i32_0 : i32, i32
  }
  func.func @transform_8(%arg0: i32) -> (i32, i32) {
    %c0_i32 = arith.constant 0 : i32
    %c0_i32_0 = arith.constant 0 : i32
    %c0_i32_1 = arith.constant 0 : i32
    return %c0_i32, %c0_i32_0 : i32, i32
  }
  func.func @transform_9(%arg0: i32) -> (i32, i32) {
    %c0_i32 = arith.constant 0 : i32
    %c0_i32_0 = arith.constant 0 : i32
    %c0_i32_1 = arith.constant 0 : i32
    return %c0_i32, %c0_i32_0 : i32, i32
  }
  func.func @transform_10(%arg0: i32) -> (i32, i32) {
    %c0_i32 = arith.constant 0 : i32
    %c0_i32_0 = arith.constant 0 : i32
    %c0_i32_1 = arith.constant 0 : i32
    return %c0_i32, %c0_i32_0 : i32, i32
  }
  func.func @transform_11(%arg0: i32) -> (i32, i32) {
    %c0_i32 = arith.constant 0 : i32
    %c0_i32_0 = arith.constant 0 : i32
    %c0_i32_1 = arith.constant 0 : i32
    return %c0_i32, %c0_i32_0 : i32, i32
  }
  func.func @transform_12(%arg0: i32) -> (i32, i32) {
    %c0_i32 = arith.constant 0 : i32
    %c0_i32_0 = arith.constant 0 : i32
    %c0_i32_1 = arith.constant 0 : i32
    return %c0_i32, %c0_i32_0 : i32, i32
  }
  func.func @transform_13(%arg0: i32) -> (i32, i32) {
    %c0_i32 = arith.constant 0 : i32
    %c0_i32_0 = arith.constant 0 : i32
    %c0_i32_1 = arith.constant 0 : i32
    return %c0_i32, %c0_i32_0 : i32, i32
  }
  func.func @transform_14(%arg0: i32) -> (i32, i32) {
    %c0_i32 = arith.constant 0 : i32
    %c0_i32_0 = arith.constant 0 : i32
    %c0_i32_1 = arith.constant 0 : i32
    return %c0_i32, %c0_i32_0 : i32, i32
  }
  func.func @transform_15(%arg0: i32) -> (i32, i32) {
    %c0_i32 = arith.constant 0 : i32
    %c0_i32_0 = arith.constant 0 : i32
    %c0_i32_1 = arith.constant 0 : i32
    return %c0_i32, %c0_i32_0 : i32, i32
  }
  func.func @transform_16(%arg0: i32) -> (i32, i32) {
    %c0_i32 = arith.constant 0 : i32
    %c0_i32_0 = arith.constant 0 : i32
    %c0_i32_1 = arith.constant 0 : i32
    return %c0_i32, %c0_i32_0 : i32, i32
  }
  func.func @transform_17(%arg0: i32) -> (i32, i32) {
    %c0_i32 = arith.constant 0 : i32
    %c0_i32_0 = arith.constant 0 : i32
    %c0_i32_1 = arith.constant 0 : i32
    return %c0_i32, %c0_i32_0 : i32, i32
  }
  func.func @transform_18(%arg0: i32) -> (i32, i32) {
    %c0_i32 = arith.constant 0 : i32
    %c0_i32_0 = arith.constant 0 : i32
    %c0_i32_1 = arith.constant 0 : i32
    return %c0_i32, %c0_i32_0 : i32, i32
  }
  func.func @transform_19(%arg0: i32) -> (i32, i32) {
    %c0_i32 = arith.constant 0 : i32
    %c0_i32_0 = arith.constant 0 : i32
    %c0_i32_1 = arith.constant 0 : i32
    return %c0_i32, %c0_i32_0 : i32, i32
  }
  func.func @transform_20(%arg0: i32) -> (i32, i32) {
    %c0_i32 = arith.constant 0 : i32
    %c0_i32_0 = arith.constant 0 : i32
    %c0_i32_1 = arith.constant 0 : i32
    return %c0_i32, %c0_i32_0 : i32, i32
  }
  func.func @transform_21(%arg0: i32) -> (i32, i32) {
    %c0_i32 = arith.constant 0 : i32
    %c0_i32_0 = arith.constant 0 : i32
    %c0_i32_1 = arith.constant 0 : i32
    return %c0_i32, %c0_i32_0 : i32, i32
  }
  func.func @transform_22(%arg0: i32) -> (i32, i32) {
    %c0_i32 = arith.constant 0 : i32
    %c0_i32_0 = arith.constant 0 : i32
    %c0_i32_1 = arith.constant 0 : i32
    return %c0_i32, %c0_i32_0 : i32, i32
  }
  func.func @transform_23(%arg0: i32) -> (i32, i32) {
    %c0_i32 = arith.constant 0 : i32
    %c0_i32_0 = arith.constant 0 : i32
    %c0_i32_1 = arith.constant 0 : i32
    return %c0_i32, %c0_i32_0 : i32, i32
  }
  func.func @transform_24(%arg0: i32) -> (i32, i32) {
    %c0_i32 = arith.constant 0 : i32
    %c0_i32_0 = arith.constant 0 : i32
    return %arg0, %c0_i32 : i32, i32
  }
  func.func @transform_25(%arg0: i32) -> (i32, i32) {
    %c0_i32 = arith.constant 0 : i32
    %c0_i32_0 = arith.constant 0 : i32
    return %arg0, %c0_i32 : i32, i32
  }
}

</mosaic_0001>

<bundles_post_ra>
// kernel: tpu_custom_call.1
= control target key start
LH: loop header
LB: loop body
LE: loop exit
PB: predicated region body
PF: predicated region fallthrough
CT: control target
= control target key end

     0   :  { %s3806_s0 = inlined_call_operand.hbm [shape: f32[16,32], index: 0, kind: input, shape index: {}]   ;;  %s3807_s1 = inlined_call_operand.vmem [shape: f32[16,8], index: 1, kind: input, shape index: {}]   ;;  %s3808_s2 = inlined_call_operand.vmem [shape: f32[1,32], index: 2, kind: input, shape index: {}]   ;;  %s3809_s3 = inlined_call_operand.hbm [shape: f32[1,32], index: 3, kind: input, shape index: {}]   ;;  %s3810_s4 = inlined_call_operand.hbm [shape: f32[1,32], index: 4, kind: input, shape index: {}]   ;;  %s3811_s5 = inlined_call_operand.hbm [shape: f32[1,32], index: 5, kind: input, shape index: {}]   ;;  %s3812_s6 = inlined_call_operand.hbm [shape: f32[1,32], index: 6, kind: input, shape index: {}]   ;;  %s3813_s7 = inlined_call_operand.hbm [shape: f32[1,32], index: 7, kind: input, shape index: {}]   ;;  %s3814_s8 = inlined_call_operand.vmem [shape: f32[32,32], index: 8, kind: input, shape index: {}]   ;;  %s3815_s9 = inlined_call_operand.hbm [shape: f32[1,32], index: 9, kind: input, shape index: {}]   ;;  %s3816_s10 = inlined_call_operand.vmem [shape: f32[32,32], index: 10, kind: input, shape index: {}]   ;;  %s3817_s11 = inlined_call_operand.hbm [shape: f32[1,32], index: 11, kind: input, shape index: {}]   ;;  %s3818_s12 = inlined_call_operand.vmem [shape: f32[32,32], index: 12, kind: input, shape index: {}]   ;;  %s3819_s13 = inlined_call_operand.vmem [shape: f32[1,32], index: 13, kind: input, shape index: {}]   ;;  %s3820_s14 = inlined_call_operand.vmem [shape: f32[32,32], index: 14, kind: input, shape index: {}]   ;;  %s3821_s15 = inlined_call_operand.vmem [shape: f32[1,32], index: 15, kind: input, shape index: {}]   ;;  %s3822_s16 = inlined_call_operand.vmem [shape: f32[1,32], index: 16, kind: input, shape index: {}]   ;;  %s3823_s17 = inlined_call_operand.vmem [shape: f32[1,32], index: 17, kind: input, shape index: {}]   ;;  %s3824_s18 = inlined_call_operand.hbm [shape: f32[32,64], index: 18, kind: input, shape index: {}]   ;;  %s3825_s19 = inlined_call_operand.vmem [shape: f32[1,64], index: 19, kind: input, shape index: {}]   ;;  %s3826_s20 = inlined_call_operand.vmem [shape: f32[64,32], index: 20, kind: input, shape index: {}]   ;;  %s3827_s21 = inlined_call_operand.vmem [shape: f32[1,32], index: 21, kind: input, shape index: {}]   ;;  %s3828_s22 = inlined_call_operand.vmem [shape: f32[1,32], index: 22, kind: input, shape index: {}]   ;;  %s3829_s23 = inlined_call_operand.vmem [shape: f32[1,32], index: 23, kind: input, shape index: {}]   ;;  %s3830_s24 = inlined_call_operand.hbm [shape: f32[16,32], index: 24, kind: output, shape index: {0}]   ;;  %s3831_s25 = inlined_call_operand.hbm [shape: f32[16,32], index: 25, kind: output, shape index: {1}]  }
   0x1   :  { %3842 = sst [smem:[#allocation28_spill]] %s3806_s0 }
   0x2   :  { %3843 = sst [smem:[#allocation29_spill]] %s3807_s1 }
   0x3   :  { %3844 = sst [smem:[#allocation30_spill]] %s3808_s2 }
   0x4   :  { %3845 = sst [smem:[#allocation31_spill]] %s3809_s3 }
   0x5   :  { %3846 = sst [smem:[#allocation32_spill]] %s3810_s4 }
   0x6   :  { %3847 = sst [smem:[#allocation33_spill]] %s3811_s5 }
   0x7   :  { %3848 = sst [smem:[#allocation34_spill]] %s3812_s6 }
   0x8   :  { %3849 = sst [smem:[#allocation35_spill]] %s3813_s7 }
   0x9   :  { %3850 = sst [smem:[#allocation36_spill]] %s3814_s8 }
   0xa   :  { %3851 = sst [smem:[#allocation37_spill]] %s3815_s9 }
   0xb   :  { %3852 = sst [smem:[#allocation38_spill]] %s3829_s23 }
   0xc   :  { %3853 = sst [smem:[#allocation39_spill]] %s3830_s24 }
   0xd   :  { %31 = vsyncpa [#allocation4], 0 }
   0xe   :  { %32 = vsyncpa [#allocation7], 0 }
   0xf   :  { %33 = vsyncpa [#allocation10], 0 }
  0x10   :  { %34 = vsyncpa [#allocation13], 0 }
  0x11   :  { %35 = vsyncpa [#allocation16], 0 }
  0x12   :  { %36 = vsyncpa [#allocation5], 0 }
  0x13   :  { %37 = vsyncpa [#allocation20], 0  ;;  %s3161_s29 = smov [#allocation6]   ;;  %s3162_s6 = smov [#allocation9]  }
  0x14   :  { %s60_s2 = sshll.u32 %s3161_s29, 4  ;;  %s80_s30 = sshll.u32 %s3162_s6, 4  ;;  %s61_s2 = int_to_ptr.vmem [resolvable:$true] %s60_s2  ;;  %s81_s30 = int_to_ptr.vmem [resolvable:$true] %s80_s30 }
  0x15   :  { %s3854_s26 = sld [smem:[#allocation31_spill]] }
  0x1b   :  { %s2905_s1 = scalar_lea.hbm %s3854_s26, 16 }
  0x1c   :  { %p2906_p0 = scmp.ne.s32.totalorder %s3854_s26, %s2905_s1  ;;  %p2909_p1 = scmp.lt.u32.totalorder %s2905_s1, %s3854_s26 }
  0x1e   :  { %p2911_p2 = pnand %p2909_p1, %p2906_p0 }
  0x20   :  { %2914 = shalt.err (!%p2911_p2)
}
  0x21   :  { %s2915_s9 = scalar_lea.vmem %s61_s2, 16  ;;  %s2919_s5 = scalar_lea.vmem %s61_s2, 32 }
  0x22   :  { %p2916_p3 = scmp.ne.s32.totalorder %s61_s2, %s2915_s9  ;;  %p2920_p4 = scmp.lt.s32.totalorder %s61_s2, %s61_s2 }
  0x23   :  { %p2921_p5 = scmp.lt.s32.totalorder %s2919_s5, %s2915_s9 }
  0x25   :  { %p2922_p6 = por %p2921_p5, %p2920_p4 }
  0x27   :  { %p2923_p7 = pnand %p2922_p6, %p2916_p3 }
  0x29   :  { %2926 = shalt.err (!%p2923_p7)
}
  0x2a   :  { %63 = dma.hbm_to_vmem [thread:$0]  %s3854_s26, 16, %s61_s2, [#allocation7]  }
  0x2b   :  { %s3855_s3 = sld [smem:[#allocation33_spill]] }
  0x31   :  { %s2927_s8 = scalar_lea.hbm %s3855_s3, 16 }
  0x32   :  { %p2928_p8 = scmp.ne.s32.totalorder %s3855_s3, %s2927_s8  ;;  %p2931_p9 = scmp.lt.u32.totalorder %s2927_s8, %s3855_s3 }
  0x34   :  { %p2933_p10 = pnand %p2931_p9, %p2928_p8 }
  0x36   :  { %2936 = shalt.err (!%p2933_p10)
}
  0x37   :  { %s2937_s9 = scalar_lea.vmem %s81_s30, 16  ;;  %s2941_s5 = scalar_lea.vmem %s81_s30, 32 }
  0x38   :  { %p2938_p11 = scmp.ne.s32.totalorder %s81_s30, %s2937_s9  ;;  %p2942_p12 = scmp.lt.s32.totalorder %s81_s30, %s81_s30 }
  0x39   :  { %p2943_p13 = scmp.lt.s32.totalorder %s2941_s5, %s2937_s9 }
  0x3b   :  { %p2944_p0 = por %p2943_p13, %p2942_p12 }
  0x3d   :  { %p2945_p1 = pnand %p2944_p0, %p2938_p11 }
  0x3f   :  { %2948 = shalt.err (!%p2945_p1)
}
  0x40   :  { %83 = dma.hbm_to_vmem [thread:$0]  %s3855_s3, 16, %s81_s30, [#allocation10]  }
  0x41   :  { %s3163_s0 = smov [#allocation12]   ;;  %s3164_s6 = smov [#allocation15]  }
  0x42   :  { %s100_s29 = sshll.u32 %s3163_s0, 4  ;;  %s124_s7 = sshll.u32 %s3164_s6, 4  ;;  %s101_s29 = int_to_ptr.vmem [resolvable:$true] %s100_s29  ;;  %s125_s7 = int_to_ptr.vmem [resolvable:$true] %s124_s7 }
  0x43   :  { %s3856_s1 = sld [smem:[#allocation35_spill]] }
  0x49   :  { %s2949_s4 = scalar_lea.hbm %s3856_s1, 16 }
  0x4a   :  { %p2950_p2 = scmp.ne.s32.totalorder %s3856_s1, %s2949_s4  ;;  %p2953_p3 = scmp.lt.u32.totalorder %s2949_s4, %s3856_s1 }
  0x4c   :  { %p2955_p4 = pnand %p2953_p3, %p2950_p2 }
  0x4e   :  { %2958 = shalt.err (!%p2955_p4)
}
  0x4f   :  { %s2959_s30 = scalar_lea.vmem %s101_s29, 16  ;;  %s2963_s3 = scalar_lea.vmem %s101_s29, 32 }
  0x50   :  { %p2960_p5 = scmp.ne.s32.totalorder %s101_s29, %s2959_s30  ;;  %p2964_p6 = scmp.lt.s32.totalorder %s101_s29, %s101_s29 }
  0x51   :  { %p2965_p7 = scmp.lt.s32.totalorder %s2963_s3, %s2959_s30 }
  0x53   :  { %p2966_p8 = por %p2965_p7, %p2964_p6 }
  0x55   :  { %p2967_p9 = pnand %p2966_p8, %p2960_p5 }
  0x57   :  { %2970 = shalt.err (!%p2967_p9)
}
  0x58   :  { %103 = dma.hbm_to_vmem [thread:$0]  %s3856_s1, 16, %s101_s29, [#allocation13]  }
  0x59   :  { %s2971_s6 = scalar_lea.hbm %s3817_s11, 16 }
  0x5a   :  { %p2972_p10 = scmp.ne.s32.totalorder %s3817_s11, %s2971_s6  ;;  %p2975_p11 = scmp.lt.u32.totalorder %s2971_s6, %s3817_s11 }
  0x5c   :  { %p2977_p12 = pnand %p2975_p11, %p2972_p10 }
  0x5e   :  { %2980 = shalt.err (!%p2977_p12)
}
  0x5f   :  { %s2981_s9 = scalar_lea.vmem %s125_s7, 16  ;;  %s2985_s5 = scalar_lea.vmem %s125_s7, 32 }
  0x60   :  { %p2982_p13 = scmp.ne.s32.totalorder %s125_s7, %s2981_s9  ;;  %p2986_p0 = scmp.lt.s32.totalorder %s125_s7, %s125_s7 }
  0x61   :  { %p2987_p1 = scmp.lt.s32.totalorder %s2985_s5, %s2981_s9 }
  0x63   :  { %p2988_p2 = por %p2987_p1, %p2986_p0 }
  0x65   :  { %p2989_p3 = pnand %p2988_p2, %p2982_p13 }
  0x67   :  { %2992 = shalt.err (!%p2989_p3)
}
  0x68   :  { %127 = dma.hbm_to_vmem [thread:$0]  %s3817_s11, 16, %s125_s7, [#allocation16]  }
  0x69   :  { %s3165_s30 = smov [#allocation3]   ;;  %s3857_s24 = sld [smem:[#allocation28_spill]] }
  0x6a   :  { %s43_s3 = sshll.u32 %s3165_s30, 4  ;;  %s44_s3 = int_to_ptr.vmem [resolvable:$true] %s43_s3 }
  0x6f   :  { %s2993_s0 = scalar_lea.hbm %s3857_s24, 256 }
  0x70   :  { %p2994_p4 = scmp.ne.s32.totalorder %s3857_s24, %s2993_s0  ;;  %p2997_p5 = scmp.lt.u32.totalorder %s2993_s0, %s3857_s24 }
  0x72   :  { %p2999_p6 = pnand %p2997_p5, %p2994_p4 }
  0x74   :  { %3002 = shalt.err (!%p2999_p6)
}
  0x75   :  { %s3003_s28 = scalar_lea.vmem %s44_s3, 256  ;;  %p3008_p8 = scmp.lt.s32.totalorder %s44_s3, %s44_s3 }
  0x76   :  { %p3004_p7 = scmp.ne.s32.totalorder %s44_s3, %s3003_s28  ;;  %p3009_p9 = scmp.lt.s32.totalorder %s3003_s28, %s3003_s28 }
  0x78   :  { %p3010_p10 = por %p3009_p9, %p3008_p8 }
  0x7a   :  { %p3011_p11 = pnand %p3010_p10, %p3004_p7 }
  0x7c   :  { %3014 = shalt.err (!%p3011_p11)
}
  0x7d   :  { %s3166_s11 = smov 128   ;;  %s3167_s7 = smov 8  }
  0x7e   :  { %49 = dma.hbm_to_vmem [thread:$0]  %s3857_s24, 256, %s44_s3, [#allocation4], %s3166_s11, %s3166_s11, %s3167_s7  }
  0x7f   :  { %s3168_s29 = smov [#allocation8]   ;;  %s3169_s30 = smov [#allocation11]  }
  0x80   :  { %s70_s1 = sshll.u32 %s3168_s29, 4  ;;  %s90_s2 = sshll.u32 %s3169_s30, 4  ;;  %s71_s1 = int_to_ptr.vmem [resolvable:$true] %s70_s1  ;;  %s91_s2 = int_to_ptr.vmem [resolvable:$true] %s90_s2 }
  0x81   :  { %s3858_s6 = sld [smem:[#allocation32_spill]] }
  0x87   :  { %s3015_s8 = scalar_lea.hbm %s3858_s6, 16 }
  0x88   :  { %p3016_p12 = scmp.ne.s32.totalorder %s3858_s6, %s3015_s8  ;;  %p3019_p13 = scmp.lt.u32.totalorder %s3015_s8, %s3858_s6 }
  0x8a   :  { %p3021_p0 = pnand %p3019_p13, %p3016_p12 }
  0x8c   :  { %3024 = shalt.err (!%p3021_p0)
}
  0x8d   :  { %s3025_s3 = scalar_lea.vmem %s71_s1, 16  ;;  %s3029_s24 = scalar_lea.vmem %s71_s1, 32 }
  0x8e   :  { %p3026_p1 = scmp.ne.s32.totalorder %s71_s1, %s3025_s3  ;;  %p3030_p2 = scmp.lt.s32.totalorder %s71_s1, %s71_s1 }
  0x8f   :  { %p3031_p3 = scmp.lt.s32.totalorder %s3029_s24, %s3025_s3 }
  0x91   :  { %p3032_p4 = por %p3031_p3, %p3030_p2 }
  0x93   :  { %p3033_p5 = pnand %p3032_p4, %p3026_p1 }
  0x95   :  { %3036 = shalt.err (!%p3033_p5)
}
  0x96   :  { %73 = dma.hbm_to_vmem [thread:$0]  %s3858_s6, 16, %s71_s1, [#allocation7]  }
  0x97   :  { %s3859_s26 = sld [smem:[#allocation34_spill]] }
  0x9d   :  { %s3037_s23 = scalar_lea.hbm %s3859_s26, 16 }
  0x9e   :  { %p3038_p6 = scmp.ne.s32.totalorder %s3859_s26, %s3037_s23  ;;  %p3041_p7 = scmp.lt.u32.totalorder %s3037_s23, %s3859_s26 }
  0xa0   :  { %p3043_p8 = pnand %p3041_p7, %p3038_p6 }
  0xa2   :  { %3046 = shalt.err (!%p3043_p8)
}
  0xa3   :  { %s3047_s28 = scalar_lea.vmem %s91_s2, 16  ;;  %s3051_s3 = scalar_lea.vmem %s91_s2, 32 }
  0xa4   :  { %p3048_p9 = scmp.ne.s32.totalorder %s91_s2, %s3047_s28  ;;  %p3052_p10 = scmp.lt.s32.totalorder %s91_s2, %s91_s2 }
  0xa5   :  { %p3053_p11 = scmp.lt.s32.totalorder %s3051_s3, %s3047_s28 }
  0xa7   :  { %p3054_p12 = por %p3053_p11, %p3052_p10 }
  0xa9   :  { %p3055_p13 = pnand %p3054_p12, %p3048_p9 }
  0xab   :  { %3058 = shalt.err (!%p3055_p13)
}
  0xac   :  { %93 = dma.hbm_to_vmem [thread:$0]  %s3859_s26, 16, %s91_s2, [#allocation10]  }
  0xad   :  { %s3170_s24 = smov [#allocation14]   ;;  %s3171_s5 = smov [#allocation17]  }
  0xae   :  { %s112_s9 = sshll.u32 %s3170_s24, 4  ;;  %s145_s29 = sshll.u32 %s3171_s5, 4  ;;  %s113_s9 = int_to_ptr.vmem [resolvable:$true] %s112_s9  ;;  %s146_s29 = int_to_ptr.vmem [resolvable:$true] %s145_s29 }
  0xaf   :  { %s3860_s0 = sld [smem:[#allocation37_spill]] }
  0xb5   :  { %s3059_s8 = scalar_lea.hbm %s3860_s0, 16 }
  0xb6   :  { %p3060_p0 = scmp.ne.s32.totalorder %s3860_s0, %s3059_s8  ;;  %p3063_p1 = scmp.lt.u32.totalorder %s3059_s8, %s3860_s0 }
  0xb8   :  { %p3065_p2 = pnand %p3063_p1, %p3060_p0 }
  0xba   :  { %3068 = shalt.err (!%p3065_p2)
}
  0xbb   :  { %s3069_s2 = scalar_lea.vmem %s113_s9, 16  ;;  %s3073_s26 = scalar_lea.vmem %s113_s9, 32 }
  0xbc   :  { %p3070_p3 = scmp.ne.s32.totalorder %s113_s9, %s3069_s2  ;;  %p3074_p4 = scmp.lt.s32.totalorder %s113_s9, %s113_s9 }
  0xbd   :  { %p3075_p5 = scmp.lt.s32.totalorder %s3073_s26, %s3069_s2 }
  0xbf   :  { %p3076_p6 = por %p3075_p5, %p3074_p4 }
  0xc1   :  { %p3077_p7 = pnand %p3076_p6, %p3070_p3 }
  0xc3   :  { %3080 = shalt.err (!%p3077_p7)
}
  0xc4   :  { %115 = dma.hbm_to_vmem [thread:$0]  %s3860_s0, 16, %s113_s9, [#allocation13]  }
  0xc5   :  { %s3081_s30 = scalar_lea.hbm %s3824_s18, 512 }
  0xc6   :  { %p3082_p8 = scmp.ne.s32.totalorder %s3824_s18, %s3081_s30  ;;  %p3085_p9 = scmp.lt.u32.totalorder %s3081_s30, %s3824_s18 }
  0xc8   :  { %p3087_p10 = pnand %p3085_p9, %p3082_p8 }
  0xca   :  { %3090 = shalt.err (!%p3087_p10)
}
  0xcb   :  { %s3091_s28 = scalar_lea.vmem %s146_s29, 512  ;;  %p3096_p12 = scmp.lt.s32.totalorder %s146_s29, %s146_s29 }
  0xcc   :  { %p3092_p11 = scmp.ne.s32.totalorder %s146_s29, %s3091_s28  ;;  %p3097_p13 = scmp.lt.s32.totalorder %s3091_s28, %s3091_s28 }
  0xce   :  { %p3098_p0 = por %p3097_p13, %p3096_p12 }
  0xd0   :  { %p3099_p1 = pnand %p3098_p0, %p3092_p11 }
  0xd2   :  { %3102 = shalt.err (!%p3099_p1)
}
  0xd3   :  { %151 = dma.hbm_to_vmem [thread:$0]  %s3824_s18, 512, %s146_s29, [#allocation16], %s3166_s11, %s3166_s11, %s3167_s7  }
  0xd4   :  { %3147 = dma.done.wait [#allocation4], 256  }
  0xd5   :  { %3148 = vsyncadd [#allocation4], 4294967040 }
  0xd6   :  { %3149 = dma.done.wait [#allocation7], 32  }
  0xd7   :  { %3150 = vsyncadd [#allocation7], 4294967264 }
  0xd8   :  { %3151 = dma.done.wait [#allocation10], 32  }
  0xd9   :  { %3152 = vsyncadd [#allocation10], 4294967264 }
  0xda   :  { %3153 = dma.done.wait [#allocation13], 32  }
  0xdb   :  { %3154 = vsyncadd [#allocation13], 4294967264 }
  0xdc   :  { %3155 = dma.done.wait [#allocation16], 528  }
  0xdd   :  { %3156 = vsyncadd [#allocation16], 4294966768  ;;  %vm193_vm0 = vcmask 261120   ;;  %v189_v0 = vld [vmem:[#allocation3] sm:$0xff]  ;;  %v190_v1 = vld [vmem:[#allocation3 + $0x8] sm:$0xff]  ;;  %s3861_s3 = sld [smem:[#allocation36_spill]] }
  0xde   :  { %v194_v2 = vsel %vm193_vm0, %v189_v0, 0.0  ;;  %v197_v3 = vsel %vm193_vm0, %v190_v1, 0.0  ;;  %v457_v16 = vld [vmem:[%s3818_s12] sm:$0xff]  ;;  %v458_v18 = vld [vmem:[%s3818_s12 + $0x8] sm:$0xff]  ;;  %v459_v23 = vld [vmem:[%s3818_s12 + $0x10] sm:$0xff]  ;;  %s3862_s1 = sld [smem:[#allocation30_spill]] }
  0xdf   :  { %195 = vadd.xlane.f32.xlu0 %v194_v2  ;;  %v2765_v21 = vpack.c.bf16 %v458_v18, %v457_v16  ;;  %v460_v24 = vld [vmem:[%s3818_s12 + $0x18] sm:$0xff]  ;;  %v365_v26 = vld [vmem:[%s3816_s10] sm:$0xff]  ;;  %v366_v27 = vld [vmem:[%s3816_s10 + $0x8] sm:$0xff]  ;;  %v3172_v60 = vmov 0.0   ;;  %vm3173_vm1 = vmmov 0   ;;  %s3174_s8 = smov 120  }
  0xe0   :  { %v2769_v25 = vpack.c.bf16 %v460_v24, %v459_v23  ;;  %v2757_v28 = vpack.c.bf16 %v366_v27, %v365_v26  ;;  %v2475_v37 = vld [vmem:[#allocation11] ss:$0 sm:$0xff]  ;;  %v2472_v39 = vld [vmem:[#allocation6] ss:$0 sm:$0xff]  ;;  %v2476_v40 = vld [vmem:[#allocation12] ss:$0 sm:$0xff] }
  0xe1   :  { %2766 = vmatprep.subr.bf16.mxu0 %v2765_v21  ;;  %v2473_v43 = vld [vmem:[#allocation8] ss:$0 sm:$0xff]  ;;  %v367_v49 = vld [vmem:[%s3816_s10 + $0x10] sm:$0xff]  ;;  %v368_v50 = vld [vmem:[%s3816_s10 + $0x18] sm:$0xff]  ;;  %vm553_vm2 = vcmask 64512   ;;  %s3176_s27 = smov 104  }
  0xe2   :  { %2768 = vmatpush3.bf16.msra.mxu0 %v2765_v21  ;;  %v2474_v53 = vld [vmem:[#allocation9] ss:$0 sm:$0xff]  ;;  %v2761_v56 = vpack.c.bf16 %v368_v50, %v367_v49  ;;  %v2483_v61 = vld [vmem:[%s3819_s13] ss:$0 sm:$0xff]  ;;  %v2477_v62 = vld [vmem:[#allocation14] ss:$0 sm:$0xff] }
  0xe3   :  { %198 = vadd.xlane.f32.xlu0 %v197_v3  ;;  %v273_v14 = vld [vmem:[%s3861_s3] sm:$0xff]  ;;  %v274_v15 = vld [vmem:[%s3861_s3 + $0x8] sm:$0xff]  ;;  %v275_v19 = vld [vmem:[%s3861_s3 + $0x10] sm:$0xff]  ;;  %2770 = vmatprep.subr.bf16.mxu0 %v2769_v25  ;;  %s3175_s13 = smov 112   ;;  %s3863_s9 = sld [smem:[#allocation29_spill]]  ;;  %vm811_vm5 = vcmask 130112  }
  0xe4   :  { %v2749_v17 = vpack.c.bf16 %v274_v15, %v273_v14  ;;  %v276_v20 = vld [vmem:[%s3861_s3 + $0x18] sm:$0xff]  ;;  %v2471_v36 = vld [vmem:[%s3862_s1] ss:$0 sm:$0xff]  ;;  %s3177_s29 = smov 16   ;;  %s3178_s3 = smov 24   ;;  %vm988_vm6 = vcmask 195712  }
  0xe5   :  { %v2753_v22 = vpack.c.bf16 %v276_v20, %v275_v19  ;;  %vm1164_vm7 = vcmask 261312  }
  0xe6   :  { %2750 = vmatprep.subr.bf16.mxu1 %v2749_v17  ;;  %2772 = vmatpush3.bf16.msra.mxu0 %v2769_v25 }
  0xe7   :  { %2752 = vmatpush3.bf16.msra.mxu1 %v2749_v17  ;;  %2638 = vmatprep.subr.mxu0 %v3172_v60 }
  0xe8   :  { %2754 = vmatprep.subr.bf16.mxu1 %v2753_v22 }
  0xe9   :  { %v549_v24 = vld [vmem:[%s3863_s9] sm:$0xff] }
  0xea   :  { %vm551_vm3 = vcmp.gt.f32.partialorder %v549_v24, 0.0 }
  0xeb   :  { %2756 = vmatpush3.bf16.msra.mxu1 %v2753_v22 }
  0xec   :  { %2758 = vmatprep.subr.bf16.mxu1 %v2757_v28 }
 0x16c   :  { %v196_v4 = vpop.xlane.xlu0 %195 }
 0x16d   :  { %v201_v5 = vmul.f32 0.03125, %v196_v4 }
 0x16f   :  { %v203_v6 = vsub.f32 %v189_v0, %v201_v5  ;;  %v2480_v5 = vld [vmem:[#allocation15] ss:$0 sm:$0xff] }
 0x170   :  { %v199_v7 = vpop.xlane.xlu0 %198 }
 0x171   :  { %v202_v8 = vmul.f32 0.03125, %v199_v7  ;;  %v205_v9 = vmul.f32 %v203_v6, %v203_v6 }
 0x173   :  { %v204_v10 = vsub.f32 %v190_v1, %v202_v8  ;;  %v207_v11 = vsel %vm193_vm0, %v205_v9, 0.0 }
 0x174   :  { %208 = vadd.xlane.f32.xlu1 %v207_v11 }
 0x175   :  { %v206_v12 = vmul.f32 %v204_v10, %v204_v10 }
 0x177   :  { %v210_v13 = vsel %vm193_vm0, %v206_v12, 0.0 }
 0x178   :  { %211 = vadd.xlane.f32.xlu1 %v210_v13 }
 0x201   :  { %v209_v29 = vpop.xlane.xlu1 %208 }
 0x202   :  { %v213_v30 = vmul.f32 0.03125, %v209_v29 }
 0x204   :  { %v215_v31 = vadd.f32 1e-05, %v213_v30 }
 0x205   :  { %v212_v32 = vpop.xlane.xlu1 %211 }
 0x206   :  { %2825 = vrsqrt.f32 %v215_v31  ;;  %v214_v33 = vmul.f32 0.03125, %v212_v32 }
 0x208   :  { %v216_v34 = vadd.f32 1e-05, %v214_v33 }
 0x20a   :  { %2827 = vrsqrt.f32 %v216_v34 }
 0x210   :  { %v2826_v35 = vpop.eup %2825 }
 0x211   :  { %v219_v38 = vmul.f32 %v2826_v35, %v203_v6 }
 0x213   :  { %v227_v41 = vmul.f32 %v2471_v36, %v219_v38  ;;  %v263_v42 = vmul.f32 %v2475_v37, %v219_v38  ;;  %v245_v48 = vmul.f32 %v2473_v43, %v219_v38 }
 0x214   :  { %v2828_v44 = vpop.eup %2827 }
 0x215   :  { %v220_v45 = vmul.f32 %v2828_v44, %v204_v10  ;;  %v3462_v46 = vadd.f32 %v2472_v39, %v227_v41  ;;  %v271_v47 = vadd.f32 %v2476_v40, %v263_v42  ;;  %v253_v57 = vadd.f32 %v2474_v53, %v245_v48 }
 0x217   :  { %v228_v51 = vmul.f32 %v2471_v36, %v220_v45  ;;  %2603 = vmatprep.mubr.msk.f32.mxu1 %vm193_vm0, %v3462_v46  ;;  %v264_v52 = vmul.f32 %v2475_v37, %v220_v45  ;;  %2625 = vmatprep.mubr.msk.f32.mxu0 %vm193_vm0, %v271_v47  ;;  %v246_v58 = vmul.f32 %v2473_v43, %v220_v45  ;;  %v550_v37 = vld [vmem:[%s3863_s9 + $0x8] sm:$0xff] }
 0x218   :  { %vm552_vm4 = vcmp.gt.f32.partialorder %v550_v37, 0.0 }
 0x219   :  { %v3473_v54 = vadd.f32 %v2472_v39, %v228_v51  ;;  %v272_v55 = vadd.f32 %v2476_v40, %v264_v52  ;;  %v254_v59 = vadd.f32 %v2474_v53, %v246_v58 }
 0x21b   :  { %2604 = vmatmul.mubr.msk.f32.vlgmr.msra.gmra.mrb[0].mxu1 %vm193_vm0, %v3473_v54  ;;  %2626 = vmatmul.mubr.msk.f32.vlgmr.msra.gmra.mrb[0].mxu0 %vm193_vm0, %v272_v55 }
 0x21c   :  { %2760 = vmatpush3.bf16.msra.mxu1 %v2757_v28  ;;  %2614 = vmatprep.mubr.msk.f32.mxu1 %vm193_vm0, %v253_v57 }
 0x21d   :  { %2762 = vmatprep.subr.bf16.mxu1 %v2761_v56  ;;  %2640 = vmatprep.mubr.msk.f32.mxu0 %vm3173_vm1, %v3172_v60 }
 0x220   :  { %2764 = vmatpush3.bf16.msra.mxu1 %v2761_v56 }
 0x221   :  { %2628 = vmatprep.subr.mxu1 %v3172_v60 }
 0x223   :  { %2615 = vmatmul.mubr.msk.f32.vlgmr.msra.gmra.mrb[2].mxu1 %vm193_vm0, %v254_v59 }
 0x224   :  { %2630 = vmatprep.mubr.msk.f32.mxu1 %vm3173_vm1, %v3172_v60 }
 0x2ee   :  { %v2605_v63 = vpop.f32.mrb[0].mxu1  ;;  %v2627_v0 = vpop.f32.mrb[0].mxu0 }
 0x2ef   :  { %v3489_v1 = vadd.f32 %v2627_v0, %v2483_v61  ;;  %v356_v2 = vpop.f32.mrb[1].mxu1  ;;  %v540_v3 = vpop.f32.mrb[1].mxu0  ;;  %v362_v11 = vadd.f32 %v2605_v63, %v2477_v62 }
 0x2f0   :  { %v357_v4 = vadd.f32 %v2477_v62, %v356_v2  ;;  %v3496_v9 = vadd.f32 %v2483_v61, %v540_v3 }
 0x2f2   :  { %717 = vrot.lane.b32.xlu1 %v357_v4, %s3174_s8 }
 0x2f6   :  { %v2616_v6 = vpop.f32.mrb[2].mxu1 }
 0x2f7   :  { %v448_v7 = vpop.f32.mrb[3].mxu1  ;;  %v454_v10 = vadd.f32 %v2616_v6, %v2480_v5 }
 0x2f8   :  { %v449_v8 = vadd.f32 %v2480_v5, %v448_v7 }
 0x2fa   :  { %719 = vrot.lane.b32.xlu0 %v449_v8, %s3174_s8  ;;  %2629 = vmatpush3.xpose.msk.msra.mxu1 %vm553_vm2, %v449_v8 }
 0x2fb   :  { %896 = vrot.lane.b32.xlu1 %v449_v8, %s3175_s13  ;;  %2633 = vmatprep.subr.mxu1 %v3172_v60 }
 0x2fd   :  { %2631 = vmatmul.mubr.msk.f32.vlgmr.msra.gmra.mrb[4].mxu1 %vm553_vm2, %v357_v4 }
 0x2fe   :  { %1072 = vrot.lane.b32.xlu0 %v449_v8, %s3176_s27  ;;  %2634 = vmatpush3.msra.mxu1 %v3496_v9 }
 0x2ff   :  { %894 = vrot.lane.b32.xlu1 %v357_v4, %s3175_s13  ;;  %2635 = vmatprep.mubr.msk.f32.mxu1 %vm3173_vm1, %v3172_v60 }
 0x300   :  { %2643 = vmatprep.subr.mxu1 %v3172_v60 }
 0x302   :  { %1411 = vrot.lane.b32.xlu0 %v454_v10, %s3174_s8 }
 0x303   :  { %1070 = vrot.lane.b32.xlu1 %v357_v4, %s3176_s27 }
 0x306   :  { %1587 = vrot.lane.b32.xlu0 %v454_v10, %s3175_s13 }
 0x307   :  { %1409 = vrot.lane.b32.xlu1 %v362_v11, %s3174_s8 }
 0x30a   :  { %1762 = vrot.lane.b32.xlu0 %v454_v10, %s3176_s27 }
 0x30b   :  { %1585 = vrot.lane.b32.xlu1 %v362_v11, %s3175_s13 }
 0x30f   :  { %1760 = vrot.lane.b32.xlu1 %v362_v11, %s3176_s27 }
 0x364   :  { %v718_v12 = vpop.permute.xlu1 %717 }
 0x36c   :  { %v720_v13 = vpop.permute.xlu0 %719 }
 0x36d   :  { %v897_v14 = vpop.permute.xlu1 %896  ;;  %2639 = vmatpush3.xpose.msk.msra.mxu0 %vm553_vm2, %v720_v13 }
 0x36e   :  { %2648 = vmatprep.subr.mxu0 %v3172_v60 }
 0x370   :  { %2641 = vmatmul.mubr.msk.f32.vlgmr.msra.gmra.mrb[2].mxu0 %vm553_vm2, %v718_v12  ;;  %v1073_v16 = vpop.permute.xlu0 %1072 }
 0x371   :  { %v895_v15 = vpop.permute.xlu1 %894  ;;  %2649 = vmatpush3.xpose.msk.msra.mxu0 %vm553_vm2, %v897_v14  ;;  %2650 = vmatprep.mubr.msk.f32.mxu0 %vm3173_vm1, %v3172_v60 }
 0x372   :  { %2658 = vmatprep.subr.mxu0 %v3172_v60 }
 0x374   :  { %2651 = vmatmul.mubr.msk.f32.vlgmr.msra.gmra.mrb[4].mxu0 %vm553_vm2, %v895_v15  ;;  %v1412_v18 = vpop.permute.xlu0 %1411 }
 0x375   :  { %v1071_v17 = vpop.permute.xlu1 %1070  ;;  %2659 = vmatpush3.xpose.msk.msra.mxu0 %vm553_vm2, %v1073_v16  ;;  %2660 = vmatprep.mubr.msk.f32.mxu0 %vm3173_vm1, %v3172_v60 }
 0x376   :  { %2668 = vmatprep.subr.mxu0 %v3172_v60 }
 0x378   :  { %2661 = vmatmul.mubr.msk.f32.vlgmr.msra.gmra.mrb[6].mxu0 %vm553_vm2, %v1071_v17  ;;  %v1588_v20 = vpop.permute.xlu0 %1587 }
 0x379   :  { %2669 = vmatpush3.xpose.msk.msra.mxu0 %vm553_vm2, %v454_v10  ;;  %2670 = vmatprep.mubr.msk.f32.mxu0 %vm3173_vm1, %v3172_v60  ;;  %v1410_v19 = vpop.permute.xlu1 %1409 }
 0x37a   :  { %2678 = vmatprep.subr.mxu0 %v3172_v60 }
 0x37c   :  { %2671 = vmatmul.mubr.msk.f32.vlgmr.msra.gmra.mrb[8].mxu0 %vm553_vm2, %v362_v11  ;;  %v1763_v22 = vpop.permute.xlu0 %1762 }
 0x37d   :  { %2679 = vmatpush3.xpose.msk.msra.mxu0 %vm553_vm2, %v1412_v18  ;;  %2680 = vmatprep.mubr.msk.f32.mxu0 %vm3173_vm1, %v3172_v60  ;;  %v1586_v21 = vpop.permute.xlu1 %1585 }
 0x37e   :  { %2688 = vmatprep.subr.mxu0 %v3172_v60 }
 0x380   :  { %2681 = vmatmul.mubr.msk.f32.vlgmr.msra.gmra.mrb[10].mxu0 %vm553_vm2, %v1410_v19 }
 0x381   :  { %2689 = vmatpush3.xpose.msk.msra.mxu0 %vm553_vm2, %v1588_v20  ;;  %2690 = vmatprep.mubr.msk.f32.mxu0 %vm3173_vm1, %v3172_v60  ;;  %v1761_v23 = vpop.permute.xlu1 %1760 }
 0x382   :  { %2698 = vmatprep.subr.mxu0 %v3172_v60 }
 0x384   :  { %2691 = vmatmul.mubr.msk.f32.vlgmr.msra.gmra.mrb[12].mxu0 %vm553_vm2, %v1586_v21 }
 0x385   :  { %2699 = vmatpush3.xpose.msk.msra.mxu0 %vm553_vm2, %v1763_v22  ;;  %2700 = vmatprep.mubr.msk.f32.mxu0 %vm3173_vm1, %v3172_v60 }
 0x388   :  { %2701 = vmatmul.mubr.msk.f32.vlgmr.msra.gmra.mrb[14].mxu0 %vm553_vm2, %v1761_v23 }
 0x3d0   :  { %v626_v25 = vpop.f32.mrb[4].mxu1 }
 0x3d1   :  { %v630_v26 = vsel %vm551_vm3, -inf, %v626_v25  ;;  %v2632_v27 = vpop.f32.mrb[5].mxu1 }
 0x3d2   :  { %v631_v28 = vsel %vm553_vm2, %v630_v26, -inf }
 0x3d3   :  { %632 = vmax.xlane.f32.xlu0 %v631_v28 }
 0x443   :  { %v791_v29 = vpop.f32.mrb[2].mxu0 }
 0x444   :  { %v795_v30 = vsel %vm551_vm3, -inf, %v791_v29  ;;  %v2642_v31 = vpop.f32.mrb[3].mxu0 }
 0x445   :  { %v796_v32 = vsel %vm553_vm2, %v795_v30, -inf }
 0x446   :  { %797 = vmax.xlane.f32.xlu1 %v796_v32 }
 0x447   :  { %v968_v33 = vpop.f32.mrb[4].mxu0 }
 0x448   :  { %v972_v34 = vsel %vm551_vm3, -inf, %v968_v33  ;;  %v2652_v35 = vpop.f32.mrb[5].mxu0 }
 0x449   :  { %v973_v36 = vsel %vm553_vm2, %v972_v34, -inf }
 0x44a   :  { %974 = vmax.xlane.f32.xlu0 %v973_v36 }
 0x44b   :  { %v1144_v38 = vpop.f32.mrb[6].mxu0 }
 0x44c   :  { %v3557_v39 = vsel %vm551_vm3, -inf, %v1144_v38  ;;  %v2662_v40 = vpop.f32.mrb[7].mxu0 }
 0x44d   :  { %v1149_v41 = vsel %vm553_vm2, %v3557_v39, -inf }
 0x44e   :  { %1150 = vmax.xlane.f32.xlu0 %v1149_v41 }
 0x44f   :  { %v1318_v42 = vpop.f32.mrb[8].mxu0 }
 0x450   :  { %v1322_v43 = vsel %vm552_vm4, -inf, %v1318_v42  ;;  %v2672_v44 = vpop.f32.mrb[9].mxu0 }
 0x451   :  { %v1323_v45 = vsel %vm553_vm2, %v1322_v43, -inf }
 0x452   :  { %1324 = vmax.xlane.f32.xlu0 %v1323_v45 }
 0x453   :  { %v1483_v47 = vpop.f32.mrb[10].mxu0 }
 0x454   :  { %v1487_v48 = vsel %vm552_vm4, -inf, %v1483_v47  ;;  %v2682_v49 = vpop.f32.mrb[11].mxu0 }
 0x455   :  { %v1488_v50 = vsel %vm553_vm2, %v1487_v48, -inf }
 0x456   :  { %1489 = vmax.xlane.f32.xlu1 %v1488_v50 }
 0x457   :  { %v1659_v51 = vpop.f32.mrb[12].mxu0 }
 0x458   :  { %v1663_v52 = vsel %vm552_vm4, -inf, %v1659_v51  ;;  %v2692_v53 = vpop.f32.mrb[13].mxu0 }
 0x459   :  { %v1664_v55 = vsel %vm553_vm2, %v1663_v52, -inf }
 0x45a   :  { %1665 = vmax.xlane.f32.xlu0 %v1664_v55 }
 0x45b   :  { %v1834_v56 = vpop.f32.mrb[14].mxu0 }
 0x45c   :  { %v1838_v57 = vsel %vm552_vm4, -inf, %v1834_v56  ;;  %v2702_v58 = vpop.f32.mrb[15].mxu0 }
 0x45d   :  { %v1839_v59 = vsel %vm553_vm2, %v1838_v57, -inf }
 0x45e   :  { %1840 = vmax.xlane.f32.xlu1 %v1839_v59 }
 0x460   :  { %v633_v61 = vpop.xlane.xlu0 %632 }
 0x461   :  { %v634_v62 = vsub.f32 %v630_v26, %v633_v61 }
 0x463   :  { %v635_v63 = vmul.f32 1.442695, %v634_v62 }
 0x465   :  { %2829 = vpow2.f32 %v635_v63 }
 0x46f   :  { %v2830_v0 = vpop.eup %2829 }
 0x470   :  { %v637_v2 = vsel %vm553_vm2, %v2830_v0, 0.0 }
 0x471   :  { %638 = vadd.xlane.f32.xlu0 %v637_v2 }
 0x4d3   :  { %v798_v3 = vpop.xlane.xlu1 %797 }
 0x4d4   :  { %v799_v4 = vsub.f32 %v795_v30, %v798_v3 }
 0x4d6   :  { %v800_v5 = vmul.f32 1.442695, %v799_v4 }
 0x4d7   :  { %v975_v6 = vpop.xlane.xlu0 %974 }
 0x4d8   :  { %2831 = vpow2.f32 %v800_v5  ;;  %v976_v7 = vsub.f32 %v972_v34, %v975_v6 }
 0x4da   :  { %v977_v8 = vmul.f32 1.442695, %v976_v7 }
 0x4db   :  { %v1151_v14 = vpop.xlane.xlu0 %1150 }
 0x4dc   :  { %2833 = vpow2.f32 %v977_v8  ;;  %v1152_v20 = vsub.f32 %v3557_v39, %v1151_v14 }
 0x4de   :  { %v1153_v25 = vmul.f32 1.442695, %v1152_v20  ;;  %v1940_v20 = vld [vmem:[%s3820_s14 + $0x18] sm:$0xff] }
 0x4df   :  { %v1325_v15 = vpop.xlane.xlu0 %1324 }
 0x4e0   :  { %v1326_v18 = vsub.f32 %v1322_v43, %v1325_v15  ;;  %v1937_v15 = vld [vmem:[%s3820_s14] sm:$0xff] }
 0x4e2   :  { %v2832_v10 = vpop.eup %2831  ;;  %v1327_v22 = vmul.f32 1.442695, %v1326_v18 }
 0x4e3   :  { %v802_v11 = vsel %vm553_vm2, %v2832_v10, 0.0  ;;  %v1490_v24 = vpop.xlane.xlu1 %1489 }
 0x4e4   :  { %803 = vadd.xlane.f32.xlu1 %v802_v11 }
 0x4e6   :  { %v3571_v12 = vpop.eup %2833 }
 0x4e7   :  { %v979_v13 = vsel %vm553_vm2, %v3571_v12, 0.0  ;;  %v1666_v16 = vpop.xlane.xlu0 %1665 }
 0x4e8   :  { %980 = vadd.xlane.f32.xlu0 %v979_v13  ;;  %v1667_v23 = vsub.f32 %v1663_v52, %v1666_v16  ;;  %v1938_v16 = vld [vmem:[%s3820_s14 + $0x8] sm:$0xff] }
 0x4ea   :  { %v1668_v26 = vmul.f32 1.442695, %v1667_v23 }
 0x4eb   :  { %v1841_v27 = vpop.xlane.xlu1 %1840 }
 0x4ec   :  { %v1842_v29 = vsub.f32 %v1838_v57, %v1841_v27 }
 0x4ee   :  { %v1843_v30 = vmul.f32 1.442695, %v1842_v29 }
 0x4f5   :  { %990 = vrot.lane.b32.xlu1 %v3496_v9, %s3175_s13 }
 0x4f9   :  { %1166 = vrot.lane.b32.xlu1 %v3496_v9, %s3176_s27 }
 0x4fd   :  { %1505 = vrot.lane.b32.xlu1 %v3489_v1, %s3174_s8 }
 0x4fe   :  { %814 = vrot.lane.b32.xlu0 %v3496_v9, %s3174_s8  ;;  %v639_v17 = vpop.xlane.xlu0 %638  ;;  %v1491_v9 = vsub.f32 %v1487_v48, %v1490_v24 }
 0x4ff   :  { %2835 = vrcp.f32 %v639_v17  ;;  %v2773_v17 = vpack.c.bf16 %v1938_v16, %v1937_v15 }
 0x500   :  { %2837 = vpow2.f32 %v1327_v22  ;;  %v1492_v28 = vmul.f32 1.442695, %v1491_v9 }
 0x501   :  { %2839 = vpow2.f32 %v1153_v25  ;;  %2774 = vmatprep.subr.bf16.mxu0 %v2773_v17 }
 0x502   :  { %2841 = vpow2.f32 %v1668_v26  ;;  %2776 = vmatpush3.bf16.msra.mxu0 %v2773_v17 }
 0x503   :  { %2843 = vpow2.f32 %v1492_v28 }
 0x504   :  { %2845 = vpow2.f32 %v1843_v30 }
 0x509   :  { %v2836_v19 = vpop.eup %2835 }
 0x50a   :  { %v641_v21 = vmul.f32 %v2836_v19, %v2830_v0  ;;  %v2838_v31 = vpop.eup %2837  ;;  %v1939_v19 = vld [vmem:[%s3820_s14 + $0x10] sm:$0xff] }
 0x50b   :  { %v2840_v32 = vpop.eup %2839  ;;  %v1329_v33 = vsel %vm553_vm2, %v2838_v31, 0.0  ;;  %v2777_v22 = vpack.c.bf16 %v1940_v20, %v1939_v19 }
 0x50c   :  { %642 = vst.msk [vmem:[#allocation19] sm:$0xff] %vm553_vm2, %v641_v21  ;;  %2636 = vmatmul.mubr.msk.f32.vlgmr.msra.gmra.mrb[6].mxu1 %vm553_vm2, %v641_v21  ;;  %v3589_v34 = vpop.eup %2841  ;;  %v1155_v35 = vsel %vm553_vm2, %v2840_v32, 0.0 }
 0x50d   :  { %2645 = vmatprep.mubr.msk.f32.mxu1 %vm3173_vm1, %v3172_v60  ;;  %v1670_v36 = vsel %vm553_vm2, %v3589_v34, 0.0  ;;  %v2844_v37 = vpop.eup %2843  ;;  %2778 = vmatprep.subr.bf16.mxu0 %v2777_v22 }
 0x50e   :  { %v1494_v38 = vsel %vm553_vm2, %v2844_v37, 0.0  ;;  %v3595_v39 = vpop.eup %2845  ;;  %2780 = vmatpush3.bf16.msra.mxu0 %v2777_v22 }
 0x50f   :  { %v1845_v40 = vsel %vm553_vm2, %v3595_v39, 0.0 }
 0x51d   :  { %1330 = vadd.xlane.f32.xlu0 %v1329_v33 }
 0x521   :  { %1156 = vadd.xlane.f32.xlu1 %v1155_v35  ;;  %1671 = vadd.xlane.f32.xlu0 %v1670_v36  ;;  %v2510_v36 = vld [vmem:[%s3821_s15] ss:$0 sm:$0xff] }
 0x525   :  { %1495 = vadd.xlane.f32.xlu1 %v1494_v38 }
 0x529   :  { %1846 = vadd.xlane.f32.xlu1 %v1845_v40 }
 0x537   :  { %1680 = vrot.lane.b32.xlu0 %v3489_v1, %s3175_s13 }
 0x53a   :  { %1855 = vrot.lane.b32.xlu1 %v3489_v1, %s3176_s27 }
 0x571   :  { %v804_v41 = vpop.xlane.xlu1 %803 }
 0x572   :  { %2847 = vrcp.f32 %v804_v41 }
 0x575   :  { %v981_v42 = vpop.xlane.xlu0 %980  ;;  %v991_v47 = vpop.permute.xlu1 %990 }
 0x576   :  { %2849 = vrcp.f32 %v981_v42 }
 0x579   :  { %v815_v43 = vpop.permute.xlu0 %814  ;;  %v1167_v50 = vpop.permute.xlu1 %1166 }
 0x57a   :  { %2644 = vmatpush3.msra.mxu1 %v815_v43 }
 0x57b   :  { %2653 = vmatprep.subr.mxu1 %v3172_v60 }
 0x57c   :  { %v2848_v44 = vpop.eup %2847 }
 0x57d   :  { %v3604_v45 = vmul.f32 %v2848_v44, %v2832_v10  ;;  %v1506_v51 = vpop.permute.xlu1 %1505 }
 0x57f   :  { %2646 = vmatmul.mubr.msk.f32.vlgmr.msra.gmra.mrb[8].mxu1 %vm553_vm2, %v3604_v45 }
 0x580   :  { %v2850_v48 = vpop.eup %2849  ;;  %2654 = vmatpush3.msra.mxu1 %v991_v47  ;;  %2655 = vmatprep.mubr.msk.f32.mxu1 %vm3173_vm1, %v3172_v60 }
 0x581   :  { %v3611_v49 = vmul.f32 %v2850_v48, %v3571_v12  ;;  %2663 = vmatprep.subr.mxu1 %v3172_v60 }
 0x583   :  { %2656 = vmatmul.mubr.msk.f32.vlgmr.msra.gmra.mrb[10].mxu1 %vm553_vm2, %v3611_v49 }
 0x584   :  { %2664 = vmatpush3.msra.mxu1 %v1167_v50  ;;  %2665 = vmatprep.mubr.msk.f32.mxu1 %vm3173_vm1, %v3172_v60 }
 0x585   :  { %2673 = vmatprep.subr.mxu1 %v3172_v60 }
 0x5aa   :  { %v1331_v52 = vpop.xlane.xlu0 %1330 }
 0x5ab   :  { %2851 = vrcp.f32 %v1331_v52 }
 0x5ae   :  { %v1157_v53 = vpop.xlane.xlu1 %1156  ;;  %v1672_v58 = vpop.xlane.xlu0 %1671 }
 0x5af   :  { %2853 = vrcp.f32 %v1157_v53 }
 0x5b2   :  { %v1496_v55 = vpop.xlane.xlu1 %1495  ;;  %v1681_v3 = vpop.permute.xlu0 %1680 }
 0x5b3   :  { %2855 = vrcp.f32 %v1496_v55 }
 0x5b4   :  { %2857 = vrcp.f32 %v1672_v58  ;;  %v2116_v58 = vld [vmem:[#allocation17 + $0x8] sm:$0xff] }
 0x5b5   :  { %v2852_v56 = vpop.eup %2851 }
 0x5b6   :  { %v1333_v57 = vmul.f32 %v2852_v56, %v2838_v31  ;;  %v1847_v62 = vpop.xlane.xlu1 %1846 }
 0x5b7   :  { %2859 = vrcp.f32 %v1847_v62 }
 0x5b8   :  { %1334 = vst.msk [vmem:[#allocation19 + $0x8] sm:$0xff] %vm553_vm2, %v1333_v57 }
 0x5b9   :  { %v2854_v59 = vpop.eup %2853 }
 0x5ba   :  { %v3620_v61 = vmul.f32 %v2854_v59, %v2840_v32  ;;  %v1856_v5 = vpop.permute.xlu1 %1855  ;;  %v2117_v59 = vld [vmem:[#allocation17 + $0x10] sm:$0xff] }
 0x5bc   :  { %2666 = vmatmul.mubr.msk.f32.vlgmr.msra.gmra.mrb[12].mxu1 %vm553_vm2, %v3620_v61 }
 0x5bd   :  { %2674 = vmatpush3.msra.mxu1 %v3489_v1  ;;  %2675 = vmatprep.mubr.msk.f32.mxu1 %vm3173_vm1, %v3172_v60  ;;  %v2856_v63 = vpop.eup %2855 }
 0x5be   :  { %2683 = vmatprep.subr.mxu1 %v3172_v60  ;;  %v3631_v0 = vmul.f32 %v2856_v63, %v2844_v37  ;;  %v2858_v2 = vpop.eup %2857  ;;  %v2118_v63 = vld [vmem:[#allocation17 + $0x18] sm:$0xff] }
 0x5bf   :  { %v3639_v1 = vmul.f32 %v2858_v2, %v3589_v34  ;;  %v2785_v2 = vpack.c.bf16 %v2118_v63, %v2117_v59  ;;  %v2250_v59 = vld [vmem:[%s3826_s20 + $0x18] sm:$0xff] }
 0x5c0   :  { %2676 = vmatmul.mubr.msk.f32.vlgmr.msra.gmra.mrb[14].mxu1 %vm553_vm2, %v1333_v57 }
 0x5c1   :  { %2684 = vmatpush3.msra.mxu1 %v1506_v51  ;;  %2685 = vmatprep.mubr.msk.f32.mxu1 %vm3173_vm1, %v3172_v60  ;;  %v2860_v4 = vpop.eup %2859 }
 0x5c2   :  { %2693 = vmatprep.subr.mxu1 %v3172_v60  ;;  %v3647_v6 = vmul.f32 %v2860_v4, %v3595_v39 }
 0x5c4   :  { %2686 = vmatmul.mubr.msk.f32.vlgmr.msra.gmra.mrb[16].mxu1 %vm553_vm2, %v3631_v0 }
 0x5c5   :  { %2694 = vmatpush3.msra.mxu1 %v1681_v3  ;;  %2695 = vmatprep.mubr.msk.f32.mxu1 %vm3173_vm1, %v3172_v60 }
 0x5c6   :  { %2703 = vmatprep.subr.mxu1 %v3172_v60 }
 0x5c8   :  { %2696 = vmatmul.mubr.msk.f32.vlgmr.msra.gmra.mrb[18].mxu1 %vm553_vm2, %v3639_v1 }
 0x5c9   :  { %2704 = vmatpush3.msra.mxu1 %v1856_v5  ;;  %2705 = vmatprep.mubr.msk.f32.mxu1 %vm3173_vm1, %v3172_v60  ;;  %vm2262_vm1 = vcmask 523264  }
 0x5cc   :  { %2706 = vmatmul.mubr.msk.f32.vlgmr.msra.gmra.mrb[20].mxu1 %vm553_vm2, %v3647_v6 }
 0x5df   :  { %v712_v7 = vpop.f32.mrb[6].mxu1 }
 0x5e0   :  { %716 = vst.msk [vmem:[#allocation2] sm:$0xff] %vm553_vm2, %v712_v7  ;;  %v2637_v8 = vpop.f32.mrb[7].mxu1 }
 0x652   :  { %v885_v10 = vpop.f32.mrb[8].mxu1 }
 0x653   :  { %890 = vrot.lane.b32.xlu0 %v885_v10, %s3167_s7  ;;  %v2647_v11 = vpop.f32.mrb[9].mxu1 }
 0x656   :  { %v1061_v12 = vpop.f32.mrb[10].mxu1 }
 0x657   :  { %1066 = vrot.lane.b32.xlu1 %v1061_v12, %s3177_s29  ;;  %v2657_v13 = vpop.f32.mrb[11].mxu1  ;;  %v2513_v12 = vld [vmem:[%s3822_s16] ss:$0 sm:$0xff] }
 0x68f   :  { %v1237_v60 = vpop.f32.mrb[12].mxu1 }
 0x690   :  { %1242 = vrot.lane.b32.xlu1 %v1237_v60, %s3178_s3  ;;  %v2667_v14 = vpop.f32.mrb[13].mxu1  ;;  %v2514_v60 = vld [vmem:[%s3823_s17] ss:$0 sm:$0xff] }
 0x693   :  { %v1404_v18 = vpop.f32.mrb[14].mxu1 }
 0x694   :  { %1408 = vst.msk [vmem:[#allocation2 + $0x8] sm:$0xff] %vm553_vm2, %v1404_v18  ;;  %v2677_v21 = vpop.f32.mrb[15].mxu1 }
 0x697   :  { %v1576_v23 = vpop.f32.mrb[16].mxu1 }
 0x698   :  { %1581 = vrot.lane.b32.xlu0 %v1576_v23, %s3167_s7  ;;  %v2687_v24 = vpop.f32.mrb[17].mxu1 }
 0x69b   :  { %v1751_v25 = vpop.f32.mrb[18].mxu1 }
 0x69c   :  { %1756 = vrot.lane.b32.xlu0 %v1751_v25, %s3177_s29  ;;  %v2697_v9 = vpop.f32.mrb[19].mxu1 }
 0x69f   :  { %v1926_v26 = vpop.f32.mrb[20].mxu1 }
 0x6a0   :  { %1931 = vrot.lane.b32.xlu1 %v1926_v26, %s3178_s3  ;;  %v2707_v27 = vpop.f32.mrb[21].mxu1 }
 0x6c5   :  { %v891_v28 = vpop.permute.xlu0 %890 }
 0x6c6   :  { %893 = vst.msk [vmem:[#allocation2] sm:$0xff] %vm811_vm5, %v891_v28 }
 0x6c9   :  { %v1067_v29 = vpop.permute.xlu1 %1066 }
 0x6ca   :  { %1069 = vst.msk [vmem:[#allocation2] sm:$0xff] %vm988_vm6, %v1067_v29 }
 0x702   :  { %v1243_v30 = vpop.permute.xlu1 %1242 }
 0x703   :  { %1245 = vst.msk [vmem:[#allocation2] sm:$0xff] %vm1164_vm7, %v1243_v30 }
 0x70a   :  { %v1582_v31 = vpop.permute.xlu0 %1581  ;;  %v1935_v32 = vld [vmem:[#allocation2] sm:$0xff] }
 0x70b   :  { %1584 = vst.msk [vmem:[#allocation2 + $0x8] sm:$0xff] %vm811_vm5, %v1582_v31  ;;  %2716 = vmatprep.mubr.msk.f32.mxu0 %vm193_vm0, %v1935_v32 }
 0x70e   :  { %v1757_v33 = vpop.permute.xlu0 %1756 }
 0x70f   :  { %1759 = vst.msk [vmem:[#allocation2 + $0x8] sm:$0xff] %vm988_vm6, %v1757_v33 }
 0x712   :  { %v1932_v34 = vpop.permute.xlu1 %1931 }
 0x713   :  { %1934 = vst.msk [vmem:[#allocation2 + $0x8] sm:$0xff] %vm1164_vm7, %v1932_v34 }
 0x71a   :  { %v1936_v35 = vld [vmem:[#allocation2 + $0x8] sm:$0xff] }
 0x71b   :  { %2717 = vmatmul.mubr.msk.f32.vlgmr.msra.gmra.mrb[16].mxu0 %vm193_vm0, %v1936_v35 }
 0x7ee   :  { %v2718_v37 = vpop.f32.mrb[16].mxu0 }
 0x7ef   :  { %v2026_v38 = vadd.f32 %v2718_v37, %v2510_v36  ;;  %v2020_v39 = vpop.f32.mrb[17].mxu0 }
 0x7f0   :  { %v2021_v40 = vadd.f32 %v2510_v36, %v2020_v39 }
 0x7f1   :  { %v2030_v41 = vadd.f32 %v2026_v38, %v3473_v54 }
 0x7f2   :  { %v2029_v42 = vadd.f32 %v2021_v40, %v3462_v46  ;;  %v2115_v46 = vld [vmem:[#allocation17] sm:$0xff] }
 0x7f3   :  { %v2036_v43 = vsel %vm193_vm0, %v2030_v41, 0.0  ;;  %v2781_v62 = vpack.c.bf16 %v2116_v58, %v2115_v46  ;;  %v2249_v58 = vld [vmem:[%s3826_s20 + $0x10] sm:$0xff] }
 0x7f4   :  { %2037 = vadd.xlane.f32.xlu1 %v2036_v43  ;;  %v2033_v44 = vsel %vm193_vm0, %v2029_v42, 0.0  ;;  %v2793_v63 = vpack.c.bf16 %v2250_v59, %v2249_v58 }
 0x7f5   :  { %2034 = vadd.xlane.f32.xlu0 %v2033_v44  ;;  %2782 = vmatprep.subr.bf16.mxu1 %v2781_v62 }
 0x7f6   :  { %2784 = vmatpush3.bf16.msra.mxu1 %v2781_v62  ;;  %v2251_v62 = vld [vmem:[%s3826_s20 + $0x20] sm:$0xff] }
 0x7f7   :  { %2786 = vmatprep.subr.bf16.mxu1 %v2785_v2 }
 0x7fa   :  { %2788 = vmatpush3.bf16.msra.mxu1 %v2785_v2  ;;  %v2252_v2 = vld [vmem:[%s3826_s20 + $0x28] sm:$0xff] }
 0x881   :  { %v2038_v47 = vpop.xlane.xlu1 %2037 }
 0x882   :  { %v2040_v48 = vmul.f32 0.03125, %v2038_v47  ;;  %v2035_v50 = vpop.xlane.xlu0 %2034 }
 0x883   :  { %v2039_v51 = vmul.f32 0.03125, %v2035_v50 }
 0x884   :  { %v2042_v52 = vsub.f32 %v2030_v41, %v2040_v48 }
 0x885   :  { %v2041_v53 = vsub.f32 %v2029_v42, %v2039_v51 }
 0x886   :  { %v2044_v57 = vmul.f32 %v2042_v52, %v2042_v52 }
 0x887   :  { %v2043_v55 = vmul.f32 %v2041_v53, %v2041_v53 }
 0x888   :  { %v2048_v54 = vsel %vm193_vm0, %v2044_v57, 0.0  ;;  %v2247_v57 = vld [vmem:[%s3826_s20] sm:$0xff] }
 0x889   :  { %v2045_v56 = vsel %vm193_vm0, %v2043_v55, 0.0 }
 0x88a   :  { %2046 = vadd.xlane.f32.xlu0 %v2045_v56 }
 0x88e   :  { %2049 = vadd.xlane.f32.xlu0 %v2048_v54  ;;  %v2248_v54 = vld [vmem:[%s3826_s20 + $0x8] sm:$0xff] }
 0x88f   :  { %v2789_v46 = vpack.c.bf16 %v2248_v54, %v2247_v57 }
 0x891   :  { %2790 = vmatprep.subr.bf16.mxu0 %v2789_v46 }
 0x892   :  { %2792 = vmatpush3.bf16.msra.mxu0 %v2789_v46 }
 0x893   :  { %2794 = vmatprep.subr.bf16.mxu0 %v2793_v63 }
 0x896   :  { %2796 = vmatpush3.bf16.msra.mxu0 %v2793_v63 }
 0x917   :  { %v2047_v3 = vpop.xlane.xlu0 %2046 }
 0x918   :  { %v2051_v4 = vmul.f32 0.03125, %v2047_v3  ;;  %v2797_v3 = vpack.c.bf16 %v2252_v2, %v2251_v62 }
 0x91a   :  { %v2053_v5 = vadd.f32 1e-05, %v2051_v4  ;;  %v2253_v4 = vld [vmem:[%s3826_s20 + $0x30] sm:$0xff]  ;;  %2798 = vmatprep.subr.bf16.mxu0 %v2797_v3 }
 0x91b   :  { %v2050_v7 = vpop.xlane.xlu0 %2049  ;;  %2800 = vmatpush3.bf16.msra.mxu0 %v2797_v3 }
 0x91c   :  { %2861 = vrsqrt.f32 %v2053_v5  ;;  %v2052_v8 = vmul.f32 0.03125, %v2050_v7  ;;  %v2254_v5 = vld [vmem:[%s3826_s20 + $0x38] sm:$0xff] }
 0x91d   :  { %v2801_v7 = vpack.c.bf16 %v2254_v5, %v2253_v4 }
 0x91e   :  { %v2054_v10 = vadd.f32 1e-05, %v2052_v8  ;;  %v2515_v8 = vld [vmem:[%s3825_s19] ss:$0 sm:$0xff] }
 0x91f   :  { %2802 = vmatprep.subr.bf16.mxu0 %v2801_v7 }
 0x920   :  { %2863 = vrsqrt.f32 %v2054_v10  ;;  %2804 = vmatpush3.bf16.msra.mxu0 %v2801_v7 }
 0x926   :  { %v2862_v11 = vpop.eup %2861 }
 0x927   :  { %v2057_v13 = vmul.f32 %v2862_v11, %v2041_v53 }
 0x929   :  { %v2065_v14 = vmul.f32 %v2513_v12, %v2057_v13 }
 0x92a   :  { %v2864_v15 = vpop.eup %2863 }
 0x92b   :  { %v3694_v16 = vadd.f32 %v2514_v60, %v2065_v14  ;;  %v2058_v17 = vmul.f32 %v2864_v15, %v2042_v52 }
 0x92d   :  { %v2081_v18 = vand.u32 2147483647, %v3694_v16  ;;  %v2066_v19 = vmul.f32 %v2513_v12, %v2058_v17  ;;  %v2075_v37 = vmax.f32 %v3694_v16, 0.0  ;;  %vm2077_vm9 = vcmp.ne.f32.partialorder %v3694_v16, %v3694_v16 }
 0x92f   :  { %v2083_v20 = vsub.f32 0.0, %v2081_v18  ;;  %v3697_v21 = vadd.f32 %v2514_v60, %v2066_v19 }
 0x931   :  { %v2085_v22 = vmul.f32 1.442695, %v2083_v20  ;;  %v2082_v23 = vand.u32 2147483647, %v3697_v21  ;;  %v2076_v47 = vmax.f32 %v3697_v21, 0.0  ;;  %vm2078_vm11 = vcmp.ne.f32.partialorder %v3697_v21, %v3697_v21 }
 0x933   :  { %2865 = vpow2.f32 %v2085_v22  ;;  %v2084_v24 = vsub.f32 0.0, %v2082_v23 }
 0x935   :  { %v2087_v25 = vmul.f32 1.442695, %v2084_v24 }
 0x937   :  { %2867 = vpow2.f32 %v2087_v25 }
 0x93d   :  { %v2866_v9 = vpop.eup %2865 }
 0x93e   :  { %v2089_v26 = vadd.f32 1.0, %v2866_v9  ;;  %v2092_v29 = vmul.f32 -0.5, %v2866_v9  ;;  %v2095_v32 = vand.u32 2147483647, %v2866_v9 }
 0x940   :  { %2869 = vlog2.f32 %v2089_v26  ;;  %v2093_v30 = vadd.f32 1.0, %v2092_v29  ;;  %vm2096_vm8 = vcmp.lt.f32.partialorder %v2095_v32, 0.0004427343 }
 0x941   :  { %v2868_v27 = vpop.eup %2867 }
 0x942   :  { %v2098_v28 = vadd.f32 1.0, %v2868_v27  ;;  %v2101_v31 = vmul.f32 -0.5, %v2868_v27  ;;  %v2094_v35 = vmul.f32 %v2866_v9, %v2093_v30  ;;  %v2104_v38 = vand.u32 2147483647, %v2868_v27 }
 0x944   :  { %2871 = vlog2.f32 %v2098_v28  ;;  %v2102_v36 = vadd.f32 1.0, %v2101_v31  ;;  %vm2105_vm10 = vcmp.lt.f32.partialorder %v2104_v38, 0.0004427343 }
 0x946   :  { %v2103_v43 = vmul.f32 %v2868_v27, %v2102_v36 }
 0x94a   :  { %v2870_v33 = vpop.eup %2869 }
 0x94b   :  { %v2091_v34 = vmul.f32 0.6931472, %v2870_v33 }
 0x94d   :  { %v2097_v39 = vsel %vm2096_vm8, %v2094_v35, %v2091_v34 }
 0x94e   :  { %v2872_v40 = vpop.eup %2871  ;;  %v2107_v41 = vadd.f32 %v2097_v39, %v2075_v37 }
 0x94f   :  { %v2100_v42 = vmul.f32 0.6931472, %v2872_v40 }
 0x950   :  { %v2109_v44 = vsel %vm2077_vm9, %v3694_v16, %v2107_v41 }
 0x951   :  { %2873 = vtanh.f32 %v2109_v44  ;;  %v2106_v48 = vsel %vm2105_vm10, %v2103_v43, %v2100_v42 }
 0x952   :  { %v2108_v50 = vadd.f32 %v2106_v48, %v2076_v47 }
 0x954   :  { %v2110_v51 = vsel %vm2078_vm11, %v3697_v21, %v2108_v50 }
 0x955   :  { %2875 = vtanh.f32 %v2110_v51  ;;  %v2518_v51 = vld [vmem:[%s3827_s21] ss:$0 sm:$0xff]  ;;  %s3179_s21 = smov [#allocation19]  }
 0x95b   :  { %v2874_v52 = vpop.eup %2873 }
 0x95c   :  { %v2113_v53 = vmul.f32 %v2874_v52, %v3694_v16 }
 0x95e   :  { %2727 = vmatprep.mubr.msk.f32.mxu1 %vm193_vm0, %v2113_v53 }
 0x95f   :  { %v2876_v55 = vpop.eup %2875 }
 0x960   :  { %v2114_v56 = vmul.f32 %v2876_v55, %v3697_v21 }
 0x962   :  { %2728 = vmatmul.mubr.msk.f32.vlgmr.msra.gmra.mrb[22].mxu1 %vm193_vm0, %v2114_v56 }
 0xa35   :  { %v2729_v10 = vpop.f32.mrb[22].mxu1 }
 0xa36   :  { %v2204_v11 = vadd.f32 %v2729_v10, %v2515_v8  ;;  %v2198_v12 = vpop.f32.mrb[23].mxu1 }
 0xa37   :  { %v2199_v13 = vadd.f32 %v2515_v8, %v2198_v12 }
 0xa38   :  { %v2214_v60 = vand.u32 2147483647, %v2204_v11  ;;  %v2208_v34 = vmax.f32 %v2204_v11, 0.0  ;;  %vm2210_vm14 = vcmp.ne.f32.partialorder %v2204_v11, %v2204_v11 }
 0xa39   :  { %v2213_v14 = vand.u32 2147483647, %v2199_v13  ;;  %v2207_v38 = vmax.f32 %v2199_v13, 0.0  ;;  %vm2209_vm15 = vcmp.ne.f32.partialorder %v2199_v13, %v2199_v13 }
 0xa3a   :  { %v2216_v15 = vsub.f32 0.0, %v2214_v60 }
 0xa3b   :  { %v2215_v17 = vsub.f32 0.0, %v2213_v14 }
 0xa3c   :  { %v2219_v18 = vmul.f32 1.442695, %v2216_v15 }
 0xa3d   :  { %v2217_v19 = vmul.f32 1.442695, %v2215_v17 }
 0xa3e   :  { %2877 = vpow2.f32 %v2219_v18 }
 0xa3f   :  { %2879 = vpow2.f32 %v2217_v19 }
 0xa48   :  { %v2878_v20 = vpop.eup %2877 }
 0xa49   :  { %v2880_v22 = vpop.eup %2879  ;;  %v2230_v23 = vadd.f32 1.0, %v2878_v20  ;;  %v2233_v25 = vmul.f32 -0.5, %v2878_v20  ;;  %v2236_v27 = vand.u32 2147483647, %v2878_v20 }
 0xa4a   :  { %v2221_v24 = vadd.f32 1.0, %v2880_v22  ;;  %v2224_v9 = vmul.f32 -0.5, %v2880_v22  ;;  %v2227_v29 = vand.u32 2147483647, %v2880_v22 }
 0xa4b   :  { %2881 = vlog2.f32 %v2230_v23  ;;  %v2234_v26 = vadd.f32 1.0, %v2233_v25  ;;  %vm2237_vm12 = vcmp.lt.f32.partialorder %v2236_v27, 0.0004427343 }
 0xa4c   :  { %2883 = vlog2.f32 %v2221_v24  ;;  %v2225_v28 = vadd.f32 1.0, %v2224_v9  ;;  %vm2228_vm13 = vcmp.lt.f32.partialorder %v2227_v29, 0.0004427343 }
 0xa4d   :  { %v2235_v33 = vmul.f32 %v2878_v20, %v2234_v26 }
 0xa4e   :  { %v2226_v36 = vmul.f32 %v2880_v22, %v2225_v28 }
 0xa55   :  { %v2882_v30 = vpop.eup %2881 }
 0xa56   :  { %v2884_v31 = vpop.eup %2883  ;;  %v2232_v32 = vmul.f32 0.6931472, %v2882_v30 }
 0xa57   :  { %v2223_v35 = vmul.f32 0.6931472, %v2884_v31 }
 0xa58   :  { %v2238_v37 = vsel %vm2237_vm12, %v2235_v33, %v2232_v32 }
 0xa59   :  { %v2240_v39 = vadd.f32 %v2238_v37, %v2208_v34  ;;  %v2229_v40 = vsel %vm2228_vm13, %v2226_v36, %v2223_v35 }
 0xa5a   :  { %v2239_v41 = vadd.f32 %v2229_v40, %v2207_v38 }
 0xa5b   :  { %v2242_v42 = vsel %vm2210_vm14, %v2204_v11, %v2240_v39 }
 0xa5c   :  { %2885 = vtanh.f32 %v2242_v42  ;;  %v2241_v43 = vsel %vm2209_vm15, %v2199_v13, %v2239_v41 }
 0xa5d   :  { %2887 = vtanh.f32 %v2241_v43 }
 0xa66   :  { %v2886_v44 = vpop.eup %2885 }
 0xa67   :  { %v2888_v47 = vpop.eup %2887  ;;  %v2246_v50 = vmul.f32 %v2886_v44, %v2204_v11 }
 0xa68   :  { %v2245_v48 = vmul.f32 %v2888_v47, %v2199_v13 }
 0xa6a   :  { %2746 = vmatprep.mubr.msk.f32.mxu0 %vm2262_vm1, %v2245_v48 }
 0xa6b   :  { %2747 = vmatmul.mubr.msk.f32.vlgmr.msra.gmra.mrb[18].mxu0 %vm2262_vm1, %v2246_v50 }
 0xb3e   :  { %v2748_v52 = vpop.f32.mrb[18].mxu0 }
 0xb3f   :  { %v2341_v53 = vadd.f32 %v2748_v52, %v2518_v51  ;;  %v2335_v55 = vpop.f32.mrb[19].mxu0 }
 0xb40   :  { %v2336_v56 = vadd.f32 %v2518_v51, %v2335_v55 }
 0xb41   :  { %v2351_v57 = vand.u32 2147483647, %v2341_v53  ;;  %v2345_v17 = vmax.f32 %v2341_v53, 0.0  ;;  %vm2347_vm4 = vcmp.ne.f32.partialorder %v2341_v53, %v2341_v53 }
 0xb42   :  { %v2350_v54 = vand.u32 2147483647, %v2336_v56  ;;  %v2344_v22 = vmax.f32 %v2336_v56, 0.0  ;;  %vm2346_vm8 = vcmp.ne.f32.partialorder %v2336_v56, %v2336_v56 }
 0xb43   :  { %v2353_v46 = vsub.f32 0.0, %v2351_v57 }
 0xb44   :  { %v2352_v58 = vsub.f32 0.0, %v2350_v54 }
 0xb45   :  { %v2356_v59 = vmul.f32 1.442695, %v2353_v46 }
 0xb46   :  { %v2354_v62 = vmul.f32 1.442695, %v2352_v58 }
 0xb47   :  { %2889 = vpow2.f32 %v2356_v59 }
 0xb48   :  { %2891 = vpow2.f32 %v2354_v62 }
 0xb51   :  { %v2890_v63 = vpop.eup %2889 }
 0xb52   :  { %v2892_v2 = vpop.eup %2891  ;;  %v2367_v3 = vadd.f32 1.0, %v2890_v63  ;;  %v2370_v5 = vmul.f32 -0.5, %v2890_v63  ;;  %v2373_v10 = vand.u32 2147483647, %v2890_v63 }
 0xb53   :  { %v2358_v4 = vadd.f32 1.0, %v2892_v2  ;;  %v2361_v7 = vmul.f32 -0.5, %v2892_v2  ;;  %v2364_v12 = vand.u32 2147483647, %v2892_v2 }
 0xb54   :  { %2893 = vlog2.f32 %v2367_v3  ;;  %v2371_v8 = vadd.f32 1.0, %v2370_v5  ;;  %vm2374_vm2 = vcmp.lt.f32.partialorder %v2373_v10, 0.0004427343 }
 0xb55   :  { %2895 = vlog2.f32 %v2358_v4  ;;  %v2362_v11 = vadd.f32 1.0, %v2361_v7  ;;  %vm2365_vm3 = vcmp.lt.f32.partialorder %v2364_v12, 0.0004427343 }
 0xb56   :  { %v2372_v15 = vmul.f32 %v2890_v63, %v2371_v8 }
 0xb57   :  { %v2363_v19 = vmul.f32 %v2892_v2, %v2362_v11 }
 0xb5e   :  { %v2894_v13 = vpop.eup %2893 }
 0xb5f   :  { %v2896_v60 = vpop.eup %2895  ;;  %v2369_v14 = vmul.f32 0.6931472, %v2894_v13 }
 0xb60   :  { %v2360_v18 = vmul.f32 0.6931472, %v2896_v60 }
 0xb61   :  { %v2375_v20 = vsel %vm2374_vm2, %v2372_v15, %v2369_v14 }
 0xb62   :  { %v2377_v23 = vadd.f32 %v2375_v20, %v2345_v17  ;;  %v2366_v24 = vsel %vm2365_vm3, %v2363_v19, %v2360_v18 }
 0xb63   :  { %v2376_v25 = vadd.f32 %v2366_v24, %v2344_v22 }
 0xb64   :  { %v2379_v9 = vsel %vm2347_vm4, %v2341_v53, %v2377_v23 }
 0xb65   :  { %2897 = vtanh.f32 %v2379_v9  ;;  %v2378_v26 = vsel %vm2346_vm8, %v2336_v56, %v2376_v25 }
 0xb66   :  { %2899 = vtanh.f32 %v2378_v26 }
 0xb6f   :  { %v2898_v27 = vpop.eup %2897 }
 0xb70   :  { %v2900_v28 = vpop.eup %2899  ;;  %v2383_v29 = vmul.f32 %v2898_v27, %v2341_v53 }
 0xb71   :  { %v2382_v30 = vmul.f32 %v2900_v28, %v2336_v56 }
 0xb72   :  { %v2385_v31 = vadd.f32 %v2383_v29, %v3697_v21 }
 0xb73   :  { %v2384_v32 = vadd.f32 %v2382_v30, %v3694_v16 }
 0xb74   :  { %v2391_v33 = vsel %vm193_vm0, %v2385_v31, 0.0 }
 0xb75   :  { %2392 = vadd.xlane.f32.xlu1 %v2391_v33  ;;  %v2388_v34 = vsel %vm193_vm0, %v2384_v32, 0.0 }
 0xb76   :  { %2389 = vadd.xlane.f32.xlu0 %v2388_v34 }
 0xb86   :  { %985 = vrot.lane.b32.xlu1 %v3611_v49, %s3177_s29 }
 0xb8a   :  { %1161 = vrot.lane.b32.xlu1 %v3620_v61, %s3178_s3 }
 0xb8c   :  { %808 = vrot.lane.b32.xlu0 %v3604_v45, %s3167_s7 }
 0xb8e   :  { %1500 = vrot.lane.b32.xlu1 %v3631_v0, %s3167_s7 }
 0xb90   :  { %1676 = vrot.lane.b32.xlu0 %v3639_v1, %s3177_s29  ;;  %s2451_s29 = sshll.u32 %s3179_s21, 4  ;;  %s2452_s29 = int_to_ptr.vmem [resolvable:$true] %s2451_s29 }
 0xb91   :  { %p3108_p3 = scmp.lt.s32.totalorder %s2452_s29, %s2452_s29 }
 0xb92   :  { %1851 = vrot.lane.b32.xlu1 %v3647_v6, %s3178_s3  ;;  %s3103_s3 = scalar_lea.vmem %s2452_s29, 256 }
 0xb93   :  { %p3104_p2 = scmp.ne.s32.totalorder %s2452_s29, %s3103_s3  ;;  %p3109_p4 = scmp.lt.s32.totalorder %s3103_s3, %s3103_s3 }
 0xb95   :  { %p3110_p5 = por %p3109_p4, %p3108_p3 }
 0xb97   :  { %p3111_p6 = pnand %p3110_p5, %p3104_p2 }
 0xc02   :  { %v2393_v35 = vpop.xlane.xlu1 %2392 }
 0xc03   :  { %v2395_v36 = vmul.f32 0.03125, %v2393_v35  ;;  %v2390_v37 = vpop.xlane.xlu0 %2389 }
 0xc04   :  { %v2394_v38 = vmul.f32 0.03125, %v2390_v37 }
 0xc05   :  { %v2397_v49 = vsub.f32 %v2385_v31, %v2395_v36 }
 0xc06   :  { %v2396_v39 = vsub.f32 %v2384_v32, %v2394_v38  ;;  %v986_v40 = vpop.permute.xlu1 %985 }
 0xc07   :  { %v809_v61 = vpop.permute.xlu0 %808  ;;  %v2399_v41 = vmul.f32 %v2397_v49, %v2397_v49 }
 0xc08   :  { %812 = vst.msk [vmem:[#allocation19] sm:$0xff] %vm811_vm5, %v809_v61  ;;  %v2398_v45 = vmul.f32 %v2396_v39, %v2396_v39 }
 0xc09   :  { %989 = vst.msk [vmem:[#allocation19] sm:$0xff] %vm988_vm6, %v986_v40  ;;  %v2403_v0 = vsel %vm193_vm0, %v2399_v41, 0.0 }
 0xc0a   :  { %2404 = vadd.xlane.f32.xlu1 %v2403_v0  ;;  %v1162_v1 = vpop.permute.xlu1 %1161  ;;  %v2400_v6 = vsel %vm193_vm0, %v2398_v45, 0.0 }
 0xc0b   :  { %1165 = vst.msk [vmem:[#allocation19] sm:$0xff] %vm1164_vm7, %v1162_v1  ;;  %2401 = vadd.xlane.f32.xlu0 %v2400_v6  ;;  %v1677_v43 = vpop.permute.xlu0 %1676 }
 0xc0e   :  { %v1501_v42 = vpop.permute.xlu1 %1500 }
 0xc0f   :  { %1503 = vst.msk [vmem:[#allocation19 + $0x8] sm:$0xff] %vm811_vm5, %v1501_v42 }
 0xc10   :  { %1679 = vst.msk [vmem:[#allocation19 + $0x8] sm:$0xff] %vm988_vm6, %v1677_v43 }
 0xc12   :  { %v1852_v44 = vpop.permute.xlu1 %1851 }
 0xc13   :  { %1854 = vst.msk [vmem:[#allocation19 + $0x8] sm:$0xff] %vm1164_vm7, %v1852_v44 }
 0xc14   :  { %3114 = shalt.err (!%p3111_p6)
}
 0xc15   :  { %s3115_s8 = scalar_lea.hbm %s3831_s25, 256 }
 0xc16   :  { %p3116_p7 = scmp.ne.s32.totalorder %s3831_s25, %s3115_s8  ;;  %p3119_p8 = scmp.lt.u32.totalorder %s3115_s8, %s3831_s25 }
 0xc18   :  { %p3121_p9 = pnand %p3119_p8, %p3116_p7 }
 0xc1a   :  { %3124 = shalt.err (!%p3121_p9)
}
 0xc1b   :  { %2457 = dma.vmem_to_hbm [thread:$0]  %s2452_s29, 256, %s3831_s25, [#allocation20], %s3166_s11, %s3166_s11, %s3167_s7  }
 0xc1c   :  { %v2521_v56 = vld [vmem:[%s3828_s22] ss:$0 sm:$0xff]  ;;  %s3864_s12 = sld [smem:[#allocation38_spill]]  ;;  %s3180_s25 = smov [#allocation18]  }
 0xc1d   :  { %s2439_s26 = sshll.u32 %s3180_s25, 4  ;;  %s2440_s26 = int_to_ptr.vmem [resolvable:$true] %s2439_s26 }
 0xc1e   :  { %s3125_s22 = scalar_lea.vmem %s2440_s26, 256  ;;  %p3130_p11 = scmp.lt.s32.totalorder %s2440_s26, %s2440_s26 }
 0xc1f   :  { %p3126_p10 = scmp.ne.s32.totalorder %s2440_s26, %s3125_s22  ;;  %p3131_p12 = scmp.lt.s32.totalorder %s3125_s22, %s3125_s22 }
 0xc21   :  { %p3132_p13 = por %p3131_p12, %p3130_p11 }
 0xc22   :  { %v2522_v58 = vld [vmem:[%s3864_s12] ss:$0 sm:$0xff] }
 0xc23   :  { %p3133_p0 = pnand %p3132_p13, %p3126_p10 }
 0xc97   :  { %v2405_v47 = vpop.xlane.xlu1 %2404 }
 0xc98   :  { %v2407_v48 = vmul.f32 0.03125, %v2405_v47  ;;  %v2402_v50 = vpop.xlane.xlu0 %2401 }
 0xc99   :  { %v2406_v51 = vmul.f32 0.03125, %v2402_v50 }
 0xc9a   :  { %v2409_v52 = vadd.f32 1e-05, %v2407_v48 }
 0xc9b   :  { %v2408_v53 = vadd.f32 1e-05, %v2406_v51 }
 0xc9c   :  { %2901 = vrsqrt.f32 %v2409_v52 }
 0xc9d   :  { %2903 = vrsqrt.f32 %v2408_v53 }
 0xca6   :  { %v2902_v55 = vpop.eup %2901 }
 0xca7   :  { %v2904_v57 = vpop.eup %2903  ;;  %v2413_v54 = vmul.f32 %v2902_v55, %v2397_v49 }
 0xca8   :  { %v2412_v46 = vmul.f32 %v2904_v57, %v2396_v39 }
 0xca9   :  { %v2421_v59 = vmul.f32 %v2521_v56, %v2413_v54 }
 0xcaa   :  { %v2420_v62 = vmul.f32 %v2521_v56, %v2412_v46 }
 0xcab   :  { %v2429_v63 = vadd.f32 %v2522_v58, %v2421_v59 }
 0xcac   :  { %v2428_v2 = vadd.f32 %v2522_v58, %v2420_v62 }
 0xcad   :  { %v2431_v3 = vadd.f32 %v2429_v63, %v3697_v21 }
 0xcae   :  { %v2430_v4 = vadd.f32 %v2428_v2, %v3694_v16 }
 0xcaf   :  { %2433 = vst.msk [vmem:[#allocation18 + $0x8] sm:$0xff] %vm193_vm0, %v2431_v3 }
 0xcb0   :  { %2432 = vst.msk [vmem:[#allocation18] sm:$0xff] %vm193_vm0, %v2430_v4 }
 0xcb1   :  { %3136 = shalt.err (!%p3133_p0)
}
 0xcb2   :  { %s3865_s24 = sld [smem:[#allocation39_spill]] }
 0xcb8   :  { %s3137_s5 = scalar_lea.hbm %s3865_s24, 256 }
 0xcb9   :  { %p3138_p1 = scmp.ne.s32.totalorder %s3865_s24, %s3137_s5  ;;  %p3141_p2 = scmp.lt.u32.totalorder %s3137_s5, %s3865_s24 }
 0xcbb   :  { %p3143_p3 = pnand %p3141_p2, %p3138_p1 }
 0xcbd   :  { %3146 = shalt.err (!%p3143_p3)
}
 0xcbe   :  { %2445 = dma.vmem_to_hbm [thread:$0]  %s2440_s26, 256, %s3865_s24, [#allocation5], %s3166_s11, %s3166_s11, %s3167_s7  }
 0xcbf   :  { %3157 = dma.done.wait [#allocation5], 256  }
 0xcc0   :  { %3158 = vsyncadd [#allocation5], 4294967040 }
 0xcc1   :  { %3159 = dma.done.wait [#allocation20], 256  }
 0xcc2   :  { %3160 = vsyncadd [#allocation20], 4294967040 }
 0xcc3   :  { %2464 = vsyncpa [#allocation4], 1 }
 0xcc4   :  { %2465 = vsyncpa [#allocation7], 1 }
 0xcc5   :  { %2466 = vsyncpa [#allocation10], 1 }
 0xcc6   :  { %2467 = vsyncpa [#allocation13], 1 }
 0xcc7   :  { %2468 = vsyncpa [#allocation16], 1 }
 0xcc8   :  { %2469 = vsyncpa [#allocation5], 1 }
 0xcc9   :  { %2470 = vsyncpa [#allocation20], 1 }

</bundles_post_ra>
